<compile_context>
chip_gen: v7x
topology: tpu7x:2x2x1
jax: 0.10.0
libtpu: 0.0.40
codegen_flags: <defaults>
</compile_context>

<pallas_src>
import jax
import jax.numpy as jnp
from jax.experimental import pallas as pl
from jax.experimental.pallas import tpu as pltpu


# ----------------------------------------------------------------------------
# Fused DownBlock kernel (one grid step = one image)
# ----------------------------------------------------------------------------
def _downblock_kernel(x_ref, wd_ref, w1_ref, w2_ref, bd_ref, b1_ref, b2_ref,
                      a_ref, o_ref, pad_ref, col_ref):
    # x_ref : (1, Ho, 2, Wo, 2*Cin) bf16   (dj, ci) folded into the lane dim
    # wd_ref: (2, 2*Cin, cp) bf16          w1/w2: (9*cout, cp) bf16
    # bd/b1/b2: (1, cp) f32, a_ref: (3, 1) f32 in SMEM
    # o_ref : (1, rows, cp) f32
    # pad_ref: VMEM (Ho+2, Wo+2, cout) f32,  col_ref: VMEM (rows, 9*cout) bf16
    ho = x_ref.shape[1]
    wo = x_ref.shape[3]
    cin2 = x_ref.shape[4]            # 2 * Cin
    cout = pad_ref.shape[-1]         # true out channels (keeps im2col K honest)
    rows = ho * wo

    def prelu(y, alpha):             # f32 epilogue
        return jnp.where(y >= 0.0, y, alpha * y)

    # Zero ONLY the 1-pixel border of the padded scratch; interior is fully
    # overwritten every step.
    pad_ref[0:1, :, :] = jnp.zeros((1, wo + 2, cout), jnp.float32)
    pad_ref[ho + 1:ho + 2, :, :] = jnp.zeros((1, wo + 2, cout), jnp.float32)
    pad_ref[:, 0:1, :] = jnp.zeros((ho + 2, 1, cout), jnp.float32)
    pad_ref[:, wo + 1:wo + 2, :] = jnp.zeros((ho + 2, 1, cout), jnp.float32)

    # ---- down: 2x2 stride-2 conv.  Vertical tap di is a leading-dim index of
    # the block; horizontal tap + input channel are already along K.  Two bf16
    # MXU matmuls with f32 accumulation.
    x0 = x_ref[0, :, 0].reshape(rows, cin2)
    x1 = x_ref[0, :, 1].reshape(rows, cin2)
    h0 = (jnp.dot(x0, wd_ref[0], preferred_element_type=jnp.float32) +
          jnp.dot(x1, wd_ref[1], preferred_element_type=jnp.float32))
    h0 = prelu(h0 + bd_ref[...], a_ref[0, 0])            # (rows, cp) f32

    # ---- 3x3 conv (pad 1): build the in-VMEM im2col matrix (rows, 9*cout)
    # once, then a single MXU matmul with K = 9*cout.
    def conv3x3(hin, w_ref, b_ref):
        pad_ref[1:ho + 1, 1:wo + 1, :] = hin[:, :cout].reshape(ho, wo, cout)
        for t in range(9):
            di, dj = t // 3, t % 3
            tap = pad_ref[di:di + ho, dj:dj + wo, :].reshape(rows, cout)
            col_ref[:, t * cout:(t + 1) * cout] = tap.astype(jnp.bfloat16)
        y = jnp.dot(col_ref[...], w_ref[...],
                    preferred_element_type=jnp.float32)
        return y + b_ref[...]                             # (rows, cp) f32

    h1 = prelu(conv3x3(h0, w1_ref, b1_ref), a_ref[1, 0])
    # conv2 + identity residual (in_ch == out_ch) + PReLU
    out = prelu(conv3x3(h1, w2_ref, b2_ref) + h0, a_ref[2, 0])

    # Lane-dense (cp-wide) unmasked store; wrapper strips the channel padding.
    o_ref[0] = out.astype(o_ref.dtype)


# ----------------------------------------------------------------------------
# Wrapper: layout prep (NCHW boundary, lane padding, weight packing)
# ----------------------------------------------------------------------------
@jax.jit
def downblock_forward(params, x_nchw):
    b, cin, h, w = x_nchw.shape
    ho, wo = h // 2, w // 2
    rows = ho * wo
    cout = params["bd"].shape[0]
    cp = ((cout + 127) // 128) * 128                     # lane-padded channels

    # Match PyTorch's 2x2/s2 conv on odd sizes (drops the last row/col).
    x_nchw = x_nchw[:, :, :2 * ho, :2 * wo]

    # Single unavoidable NCHW->NHWC relayout (+ bf16 cast, halving input DMA);
    # everything after is a free reshape -- space-to-depth happens in-kernel.
    # TODO(synk): fold this transpose into the input DMA via
    # CompilerParams(allow_input_fusion=...) once validated per generation.
    x = jnp.transpose(x_nchw, (0, 2, 3, 1)).astype(jnp.bfloat16)
    x5 = x.reshape(b, ho, 2, wo, 2 * cin)                # (B, Ho, 2, Wo, 2*Cin)

    def pad_n(a):                                        # zero-pad N dim to cp
        return jnp.pad(a, ((0, 0),) * (a.ndim - 1) + ((0, cp - cout),))

    wd = pad_n(params["wd"].reshape(2, 2 * cin, cout)).astype(jnp.bfloat16)
    w1 = pad_n(params["w1"].reshape(9 * cout, cout)).astype(jnp.bfloat16)
    w2 = pad_n(params["w2"].reshape(9 * cout, cout)).astype(jnp.bfloat16)
    bd = pad_n(params["bd"].reshape(1, cout)).astype(jnp.float32)
    b1 = pad_n(params["b1"].reshape(1, cout)).astype(jnp.float32)
    b2 = pad_n(params["b2"].reshape(1, cout)).astype(jnp.float32)
    alphas = jnp.stack([params["ad"], params["a1"], params["a2"]]
                       ).astype(jnp.float32).reshape(3, 1)

    # Generation-aware VMEM budget (~48 MiB on v7x, 96 MiB on v5e/v6e).
    try:
        vmem_cap = int(pltpu.get_tpu_info().vmem_capacity_bytes)
    except Exception:
        vmem_cap = 128 * 1024 * 1024
    vmem_limit = min(int(0.75 * vmem_cap), 96 * 1024 * 1024)

    flops = 2 * b * rows * (4 * cin * cp + 18 * cout * cp)
    bytes_accessed = (x5.size * 2 + (wd.size + w1.size + w2.size) * 2
                      + (bd.size + b1.size + b2.size) * 4 + b * rows * cp * 4)

    out = pl.pallas_call(
        _downblock_kernel,
        out_shape=jax.ShapeDtypeStruct((b, rows, cp), jnp.float32),
        grid=(b,),
        in_specs=[
            pl.BlockSpec((1, ho, 2, wo, 2 * cin), lambda i: (i, 0, 0, 0, 0)),
            pl.BlockSpec((2, 2 * cin, cp), lambda i: (0, 0, 0)),
            pl.BlockSpec((9 * cout, cp), lambda i: (0, 0)),
            pl.BlockSpec((9 * cout, cp), lambda i: (0, 0)),
            pl.BlockSpec((1, cp), lambda i: (0, 0)),
            pl.BlockSpec((1, cp), lambda i: (0, 0)),
            pl.BlockSpec((1, cp), lambda i: (0, 0)),
            pl.BlockSpec(memory_space=pltpu.MemorySpace.SMEM),   # PReLU slopes
        ],
        out_specs=pl.BlockSpec((1, rows, cp), lambda i: (i, 0, 0)),
        scratch_shapes=[
            pltpu.VMEM((ho + 2, wo + 2, cout), jnp.float32),     # padded act
            pltpu.VMEM((rows, 9 * cout), jnp.bfloat16),          # im2col
        ],
        compiler_params=pltpu.CompilerParams(
            dimension_semantics=("parallel",),
            vmem_limit_bytes=vmem_limit,
        ),
        cost_estimate=pl.CostEstimate(
            flops=flops, transcendentals=0, bytes_accessed=bytes_accessed),
    )(x5, wd, w1, w2, bd, b1, b2, alphas)

    out = out[:, :, :cout].reshape(b, ho, wo, cout)
    return jnp.transpose(out, (0, 3, 1, 2))              # back to NCHW


# ----------------------------------------------------------------------------
# Pure-JAX reference (for correctness check) and parameter init
# ----------------------------------------------------------------------------
def downblock_ref(params, x_nchw):
    dn = ("NHWC", "HWIO", "NHWC")
    prec = jax.lax.Precision.HIGHEST

    def conv(v, w, b, stride, pad):
        y = jax.lax.conv_general_dilated(
            v, w, (stride, stride), [(pad, pad), (pad, pad)],
            dimension_numbers=dn, precision=prec)
        return y + b

    prelu = lambda v, a: jnp.where(v >= 0.0, v, a * v)
    x = jnp.transpose(x_nchw, (0, 2, 3, 1))
    h0 = prelu(conv(x, params["wd"], params["bd"], 2, 0), params["ad"])
    h1 = prelu(conv(h0, params["w1"], params["b1"], 1, 1), params["a1"])
    out = prelu(conv(h1, params["w2"], params["b2"], 1, 1) + h0, params["a2"])
    return jnp.transpose(out, (0, 3, 1, 2))


def init_params(key, in_ch, out_ch):
    ks = jax.random.split(key, 6)
    return {
        "wd": jax.random.normal(ks[0], (2, 2, in_ch, out_ch), jnp.float32) * 0.1,
        "bd": jax.random.normal(ks[1], (out_ch,), jnp.float32) * 0.1,
        "ad": jnp.float32(0.25),                       # nn.PReLU() default
        "w1": jax.random.normal(ks[2], (3, 3, out_ch, out_ch), jnp.float32) * 0.1,
        "b1": jax.random.normal(ks[3], (out_ch,), jnp.float32) * 0.1,
        "a1": jnp.float32(0.25),
        "w2": jax.random.normal(ks[4], (3, 3, out_ch, out_ch), jnp.float32) * 0.1,
        "b2": jax.random.normal(ks[5], (out_ch,), jnp.float32) * 0.1,
        "a2": jnp.float32(0.25),
    }


if __name__ == "__main__":
    key = jax.random.PRNGKey(0)
    pkey, xkey = jax.random.split(key)

    B, IN_CH, OUT_CH, H, W = 2, 4, 8, 16, 16
    params = init_params(pkey, IN_CH, OUT_CH)
    x = jax.random.normal(xkey, (B, IN_CH, H, W), jnp.float32)   # NCHW like PyTorch

    out = downblock_forward(params, x)
    jax.block_until_ready(out)

    assert out.shape == (B, OUT_CH, H // 2, W // 2), out.shape
    assert bool(jnp.all(jnp.isfinite(out)))

    ref = downblock_ref(params, x)
    err = float(jnp.max(jnp.abs(out - ref)))
    # bf16 MXU operands (f32 accumulation) vs. pure-f32 reference -> relaxed tol.
    assert err < 5e-2, f"max abs error vs reference: {err}"
    print("KERNEL_OK")
</pallas_src>

<mosaic_0001>
module attributes {stable_mosaic.version = 11 : i64} {
  func.func @_downblock_kernel(%arg0: i32, %arg1: memref<1x8x2x8x8xbf16, #tpu.memory_space<vmem>>, %arg2: memref<2x8x128xbf16, #tpu.memory_space<vmem>>, %arg3: memref<72x128xbf16, #tpu.memory_space<vmem>>, %arg4: memref<72x128xbf16, #tpu.memory_space<vmem>>, %arg5: memref<1x128xf32, #tpu.memory_space<vmem>>, %arg6: memref<1x128xf32, #tpu.memory_space<vmem>>, %arg7: memref<1x128xf32, #tpu.memory_space<vmem>>, %arg8: memref<3x1xf32, #tpu.memory_space<smem>>, %arg9: memref<1x64x128xf32, #tpu.memory_space<vmem>>, %arg10: memref<10x10x8xf32, #tpu.memory_space<vmem>>, %arg11: memref<64x72xbf16, #tpu.memory_space<vmem>>) attributes {dimension_semantics = [#tpu.dimension_semantics<parallel>], iteration_bounds = array<i64: 2>, scalar_prefetch = 0 : i64, scratch_operands = 2 : i64, tpu.core_type = #tpu.core_type<tc>, window_params = [{transform_indices = @transform_0, window_bounds = array<i64: 1, 8, 2, 8, 8>}, {pipeline_mode = #tpu.pipeline_mode<synchronous>, transform_indices = @transform_1, window_bounds = array<i64: 2, 8, 128>}, {pipeline_mode = #tpu.pipeline_mode<synchronous>, transform_indices = @transform_2, window_bounds = array<i64: 72, 128>}, {pipeline_mode = #tpu.pipeline_mode<synchronous>, transform_indices = @transform_3, window_bounds = array<i64: 72, 128>}, {pipeline_mode = #tpu.pipeline_mode<synchronous>, transform_indices = @transform_4, window_bounds = array<i64: 1, 128>}, {pipeline_mode = #tpu.pipeline_mode<synchronous>, transform_indices = @transform_5, window_bounds = array<i64: 1, 128>}, {pipeline_mode = #tpu.pipeline_mode<synchronous>, transform_indices = @transform_6, window_bounds = array<i64: 1, 128>}, {transform_indices = @transform_7, window_bounds = array<i64: 3, 1>}, {transform_indices = @transform_8, window_bounds = array<i64: 1, 64, 128>}]} {
    %cst = arith.constant 0.000000e+00 : f32
    %0 = vector.broadcast %cst : f32 to vector<1x10x8xf32>
    %c0 = arith.constant 0 : index
    %c0_0 = arith.constant 0 : index
    %c0_1 = arith.constant 0 : index
    %1 = vector.load %arg10[%c0, %c0_0, %c0_1] : memref<10x10x8xf32, #tpu.memory_space<vmem>>, vector<1x10x8xf32>
    tpu.vector_store %arg10[%c0, %c0_0, %c0_1], %0 {strides = array<i32>} : memref<10x10x8xf32, #tpu.memory_space<vmem>>, vector<1x10x8xf32>,
    %cst_2 = arith.constant 0.000000e+00 : f32
    %2 = vector.broadcast %cst_2 : f32 to vector<1x10x8xf32>
    %c9 = arith.constant 9 : index
    %c0_3 = arith.constant 0 : index
    %c0_4 = arith.constant 0 : index
    %3 = vector.load %arg10[%c9, %c0_3, %c0_4] : memref<10x10x8xf32, #tpu.memory_space<vmem>>, vector<1x10x8xf32>
    tpu.vector_store %arg10[%c9, %c0_3, %c0_4], %2 {strides = array<i32>} : memref<10x10x8xf32, #tpu.memory_space<vmem>>, vector<1x10x8xf32>,
    %cst_5 = arith.constant 0.000000e+00 : f32
    %4 = vector.broadcast %cst_5 : f32 to vector<10x1x8xf32>
    %c0_6 = arith.constant 0 : index
    %c0_7 = arith.constant 0 : index
    %c0_8 = arith.constant 0 : index
    %5 = vector.load %arg10[%c0_6, %c0_7, %c0_8] : memref<10x10x8xf32, #tpu.memory_space<vmem>>, vector<10x1x8xf32>
    tpu.vector_store %arg10[%c0_6, %c0_7, %c0_8], %4 {strides = array<i32>} : memref<10x10x8xf32, #tpu.memory_space<vmem>>, vector<10x1x8xf32>,
    %cst_9 = arith.constant 0.000000e+00 : f32
    %6 = vector.broadcast %cst_9 : f32 to vector<10x1x8xf32>
    %c0_10 = arith.constant 0 : index
    %c9_11 = arith.constant 9 : index
    %c0_12 = arith.constant 0 : index
    %7 = vector.load %arg10[%c0_10, %c9_11, %c0_12] : memref<10x10x8xf32, #tpu.memory_space<vmem>>, vector<10x1x8xf32>
    tpu.vector_store %arg10[%c0_10, %c9_11, %c0_12], %6 {strides = array<i32>} : memref<10x10x8xf32, #tpu.memory_space<vmem>>, vector<10x1x8xf32>,
    %c0_13 = arith.constant 0 : index
    %c0_14 = arith.constant 0 : index
    %c0_15 = arith.constant 0 : index
    %c0_16 = arith.constant 0 : index
    %c0_17 = arith.constant 0 : index
    %8 = vector.load %arg1[%c0_13, %c0_14, %c0_15, %c0_16, %c0_17] : memref<1x8x2x8x8xbf16, #tpu.memory_space<vmem>>, vector<1x8x1x8x8xbf16>
    %9 = vector.shape_cast %8 : vector<1x8x1x8x8xbf16> to vector<8x8x8xbf16>
    %10 = vector.shape_cast %9 : vector<8x8x8xbf16> to vector<64x8xbf16>
    %c0_18 = arith.constant 0 : index
    %c0_19 = arith.constant 0 : index
    %c1 = arith.constant 1 : index
    %c0_20 = arith.constant 0 : index
    %c0_21 = arith.constant 0 : index
    %11 = vector.load %arg1[%c0_18, %c0_19, %c1, %c0_20, %c0_21] : memref<1x8x2x8x8xbf16, #tpu.memory_space<vmem>>, vector<1x8x1x8x8xbf16>
    %12 = vector.shape_cast %11 : vector<1x8x1x8x8xbf16> to vector<8x8x8xbf16>
    %13 = vector.shape_cast %12 : vector<8x8x8xbf16> to vector<64x8xbf16>
    %c0_22 = arith.constant 0 : index
    %c0_23 = arith.constant 0 : index
    %c0_24 = arith.constant 0 : index
    %14 = vector.load %arg2[%c0_22, %c0_23, %c0_24] : memref<2x8x128xbf16, #tpu.memory_space<vmem>>, vector<1x8x128xbf16>
    %15 = vector.shape_cast %14 : vector<1x8x128xbf16> to vector<8x128xbf16>
    %cst_25 = arith.constant dense<0.000000e+00> : vector<64x128xf32>
    %16 = tpu.matmul %10, %15, %cst_25 {dimension_numbers = #tpu.dot_dimension_numbers<[1], [0], [0], [1], [0, 0, 1, 1], [], []>} : vector<64x8xbf16>, vector<8x128xbf16>, vector<64x128xf32> -> vector<64x128xf32>
    %c1_26 = arith.constant 1 : index
    %c0_27 = arith.constant 0 : index
    %c0_28 = arith.constant 0 : index
    %17 = vector.load %arg2[%c1_26, %c0_27, %c0_28] : memref<2x8x128xbf16, #tpu.memory_space<vmem>>, vector<1x8x128xbf16>
    %18 = vector.shape_cast %17 : vector<1x8x128xbf16> to vector<8x128xbf16>
    %cst_29 = arith.constant dense<0.000000e+00> : vector<64x128xf32>
    %19 = tpu.matmul %13, %18, %cst_29 {dimension_numbers = #tpu.dot_dimension_numbers<[1], [0], [0], [1], [0, 0, 1, 1], [], []>} : vector<64x8xbf16>, vector<8x128xbf16>, vector<64x128xf32> -> vector<64x128xf32>
    %20 = arith.addf %16, %19 : vector<64x128xf32>
    %c0_30 = arith.constant 0 : index
    %c0_31 = arith.constant 0 : index
    %21 = vector.load %arg5[%c0_30, %c0_31] : memref<1x128xf32, #tpu.memory_space<vmem>>, vector<1x128xf32>
    %22 = vector.broadcast %21 : vector<1x128xf32> to vector<64x128xf32>
    %23 = arith.addf %20, %22 : vector<64x128xf32>
    %c0_32 = arith.constant 0 : index
    %c0_33 = arith.constant 0 : index
    %24 = memref.load %arg8[%c0_32, %c0_33] : memref<3x1xf32, #tpu.memory_space<smem>>
    %cst_34 = arith.constant 0.000000e+00 : f32
    %25 = vector.broadcast %cst_34 : f32 to vector<64x128xf32>
    %26 = arith.cmpf oge, %23, %25 : vector<64x128xf32>
    %27 = vector.broadcast %24 : f32 to vector<64x128xf32>
    %28 = arith.mulf %27, %23 : vector<64x128xf32>
    %29 = arith.select %26, %23, %28 : vector<64x128xi1>, vector<64x128xf32>
    %30 = vector.extract_strided_slice %29 {offsets = [0, 0], sizes = [64, 8], strides = [1, 1]} : vector<64x128xf32> to vector<64x8xf32>
    %31 = vector.shape_cast %30 : vector<64x8xf32> to vector<8x8x8xf32>
    %c1_35 = arith.constant 1 : index
    %c1_36 = arith.constant 1 : index
    %c0_37 = arith.constant 0 : index
    %32 = vector.load %arg10[%c1_35, %c1_36, %c0_37] : memref<10x10x8xf32, #tpu.memory_space<vmem>>, vector<8x8x8xf32>
    tpu.vector_store %arg10[%c1_35, %c1_36, %c0_37], %31 {strides = array<i32>} : memref<10x10x8xf32, #tpu.memory_space<vmem>>, vector<8x8x8xf32>,
    %c0_38 = arith.constant 0 : index
    %c0_39 = arith.constant 0 : index
    %c0_40 = arith.constant 0 : index
    %33 = vector.load %arg10[%c0_38, %c0_39, %c0_40] : memref<10x10x8xf32, #tpu.memory_space<vmem>>, vector<8x8x8xf32>
    %34 = vector.shape_cast %33 : vector<8x8x8xf32> to vector<64x8xf32>
    %35 = arith.truncf %34 : vector<64x8xf32> to vector<64x8xbf16>
    %c0_41 = arith.constant 0 : index
    %c0_42 = arith.constant 0 : index
    %36 = vector.load %arg11[%c0_41, %c0_42] : memref<64x72xbf16, #tpu.memory_space<vmem>>, vector<64x8xbf16>
    tpu.vector_store %arg11[%c0_41, %c0_42], %35 {strides = array<i32>} : memref<64x72xbf16, #tpu.memory_space<vmem>>, vector<64x8xbf16>,
    %c0_43 = arith.constant 0 : index
    %c1_44 = arith.constant 1 : index
    %c0_45 = arith.constant 0 : index
    %37 = vector.load %arg10[%c0_43, %c1_44, %c0_45] : memref<10x10x8xf32, #tpu.memory_space<vmem>>, vector<8x8x8xf32>
    %38 = vector.shape_cast %37 : vector<8x8x8xf32> to vector<64x8xf32>
    %39 = arith.truncf %38 : vector<64x8xf32> to vector<64x8xbf16>
    %c0_46 = arith.constant 0 : index
    %c8 = arith.constant 8 : index
    %40 = vector.load %arg11[%c0_46, %c8] : memref<64x72xbf16, #tpu.memory_space<vmem>>, vector<64x8xbf16>
    tpu.vector_store %arg11[%c0_46, %c8], %39 {strides = array<i32>} : memref<64x72xbf16, #tpu.memory_space<vmem>>, vector<64x8xbf16>,
    %c0_47 = arith.constant 0 : index
    %c2 = arith.constant 2 : index
    %c0_48 = arith.constant 0 : index
    %41 = vector.load %arg10[%c0_47, %c2, %c0_48] : memref<10x10x8xf32, #tpu.memory_space<vmem>>, vector<8x8x8xf32>
    %42 = vector.shape_cast %41 : vector<8x8x8xf32> to vector<64x8xf32>
    %43 = arith.truncf %42 : vector<64x8xf32> to vector<64x8xbf16>
    %c0_49 = arith.constant 0 : index
    %c16 = arith.constant 16 : index
    %44 = vector.load %arg11[%c0_49, %c16] : memref<64x72xbf16, #tpu.memory_space<vmem>>, vector<64x8xbf16>
    tpu.vector_store %arg11[%c0_49, %c16], %43 {strides = array<i32>} : memref<64x72xbf16, #tpu.memory_space<vmem>>, vector<64x8xbf16>,
    %c1_50 = arith.constant 1 : index
    %c0_51 = arith.constant 0 : index
    %c0_52 = arith.constant 0 : index
    %45 = vector.load %arg10[%c1_50, %c0_51, %c0_52] : memref<10x10x8xf32, #tpu.memory_space<vmem>>, vector<8x8x8xf32>
    %46 = vector.shape_cast %45 : vector<8x8x8xf32> to vector<64x8xf32>
    %47 = arith.truncf %46 : vector<64x8xf32> to vector<64x8xbf16>
    %c0_53 = arith.constant 0 : index
    %c24 = arith.constant 24 : index
    %48 = vector.load %arg11[%c0_53, %c24] : memref<64x72xbf16, #tpu.memory_space<vmem>>, vector<64x8xbf16>
    tpu.vector_store %arg11[%c0_53, %c24], %47 {strides = array<i32>} : memref<64x72xbf16, #tpu.memory_space<vmem>>, vector<64x8xbf16>,
    %c1_54 = arith.constant 1 : index
    %c1_55 = arith.constant 1 : index
    %c0_56 = arith.constant 0 : index
    %49 = vector.load %arg10[%c1_54, %c1_55, %c0_56] : memref<10x10x8xf32, #tpu.memory_space<vmem>>, vector<8x8x8xf32>
    %50 = vector.shape_cast %49 : vector<8x8x8xf32> to vector<64x8xf32>
    %51 = arith.truncf %50 : vector<64x8xf32> to vector<64x8xbf16>
    %c0_57 = arith.constant 0 : index
    %c32 = arith.constant 32 : index
    %52 = vector.load %arg11[%c0_57, %c32] : memref<64x72xbf16, #tpu.memory_space<vmem>>, vector<64x8xbf16>
    tpu.vector_store %arg11[%c0_57, %c32], %51 {strides = array<i32>} : memref<64x72xbf16, #tpu.memory_space<vmem>>, vector<64x8xbf16>,
    %c1_58 = arith.constant 1 : index
    %c2_59 = arith.constant 2 : index
    %c0_60 = arith.constant 0 : index
    %53 = vector.load %arg10[%c1_58, %c2_59, %c0_60] : memref<10x10x8xf32, #tpu.memory_space<vmem>>, vector<8x8x8xf32>
    %54 = vector.shape_cast %53 : vector<8x8x8xf32> to vector<64x8xf32>
    %55 = arith.truncf %54 : vector<64x8xf32> to vector<64x8xbf16>
    %c0_61 = arith.constant 0 : index
    %c40 = arith.constant 40 : index
    %56 = vector.load %arg11[%c0_61, %c40] : memref<64x72xbf16, #tpu.memory_space<vmem>>, vector<64x8xbf16>
    tpu.vector_store %arg11[%c0_61, %c40], %55 {strides = array<i32>} : memref<64x72xbf16, #tpu.memory_space<vmem>>, vector<64x8xbf16>,
    %c2_62 = arith.constant 2 : index
    %c0_63 = arith.constant 0 : index
    %c0_64 = arith.constant 0 : index
    %57 = vector.load %arg10[%c2_62, %c0_63, %c0_64] : memref<10x10x8xf32, #tpu.memory_space<vmem>>, vector<8x8x8xf32>
    %58 = vector.shape_cast %57 : vector<8x8x8xf32> to vector<64x8xf32>
    %59 = arith.truncf %58 : vector<64x8xf32> to vector<64x8xbf16>
    %c0_65 = arith.constant 0 : index
    %c48 = arith.constant 48 : index
    %60 = vector.load %arg11[%c0_65, %c48] : memref<64x72xbf16, #tpu.memory_space<vmem>>, vector<64x8xbf16>
    tpu.vector_store %arg11[%c0_65, %c48], %59 {strides = array<i32>} : memref<64x72xbf16, #tpu.memory_space<vmem>>, vector<64x8xbf16>,
    %c2_66 = arith.constant 2 : index
    %c1_67 = arith.constant 1 : index
    %c0_68 = arith.constant 0 : index
    %61 = vector.load %arg10[%c2_66, %c1_67, %c0_68] : memref<10x10x8xf32, #tpu.memory_space<vmem>>, vector<8x8x8xf32>
    %62 = vector.shape_cast %61 : vector<8x8x8xf32> to vector<64x8xf32>
    %63 = arith.truncf %62 : vector<64x8xf32> to vector<64x8xbf16>
    %c0_69 = arith.constant 0 : index
    %c56 = arith.constant 56 : index
    %64 = vector.load %arg11[%c0_69, %c56] : memref<64x72xbf16, #tpu.memory_space<vmem>>, vector<64x8xbf16>
    tpu.vector_store %arg11[%c0_69, %c56], %63 {strides = array<i32>} : memref<64x72xbf16, #tpu.memory_space<vmem>>, vector<64x8xbf16>,
    %c2_70 = arith.constant 2 : index
    %c2_71 = arith.constant 2 : index
    %c0_72 = arith.constant 0 : index
    %65 = vector.load %arg10[%c2_70, %c2_71, %c0_72] : memref<10x10x8xf32, #tpu.memory_space<vmem>>, vector<8x8x8xf32>
    %66 = vector.shape_cast %65 : vector<8x8x8xf32> to vector<64x8xf32>
    %67 = arith.truncf %66 : vector<64x8xf32> to vector<64x8xbf16>
    %c0_73 = arith.constant 0 : index
    %c64 = arith.constant 64 : index
    %68 = vector.load %arg11[%c0_73, %c64] : memref<64x72xbf16, #tpu.memory_space<vmem>>, vector<64x8xbf16>
    tpu.vector_store %arg11[%c0_73, %c64], %67 {strides = array<i32>} : memref<64x72xbf16, #tpu.memory_space<vmem>>, vector<64x8xbf16>,
    %c0_74 = arith.constant 0 : index
    %c0_75 = arith.constant 0 : index
    %69 = vector.load %arg11[%c0_74, %c0_75] : memref<64x72xbf16, #tpu.memory_space<vmem>>, vector<64x72xbf16>
    %c0_76 = arith.constant 0 : index
    %c0_77 = arith.constant 0 : index
    %70 = vector.load %arg3[%c0_76, %c0_77] : memref<72x128xbf16, #tpu.memory_space<vmem>>, vector<72x128xbf16>
    %cst_78 = arith.constant dense<0.000000e+00> : vector<64x128xf32>
    %71 = tpu.matmul %69, %70, %cst_78 {dimension_numbers = #tpu.dot_dimension_numbers<[1], [0], [0], [1], [0, 0, 1, 1], [], []>} : vector<64x72xbf16>, vector<72x128xbf16>, vector<64x128xf32> -> vector<64x128xf32>
    %c0_79 = arith.constant 0 : index
    %c0_80 = arith.constant 0 : index
    %72 = vector.load %arg6[%c0_79, %c0_80] : memref<1x128xf32, #tpu.memory_space<vmem>>, vector<1x128xf32>
    %73 = vector.broadcast %72 : vector<1x128xf32> to vector<64x128xf32>
    %74 = arith.addf %71, %73 : vector<64x128xf32>
    %c1_81 = arith.constant 1 : index
    %c0_82 = arith.constant 0 : index
    %75 = memref.load %arg8[%c1_81, %c0_82] : memref<3x1xf32, #tpu.memory_space<smem>>
    %cst_83 = arith.constant 0.000000e+00 : f32
    %76 = vector.broadcast %cst_83 : f32 to vector<64x128xf32>
    %77 = arith.cmpf oge, %74, %76 : vector<64x128xf32>
    %78 = vector.broadcast %75 : f32 to vector<64x128xf32>
    %79 = arith.mulf %78, %74 : vector<64x128xf32>
    %80 = arith.select %77, %74, %79 : vector<64x128xi1>, vector<64x128xf32>
    %81 = vector.extract_strided_slice %80 {offsets = [0, 0], sizes = [64, 8], strides = [1, 1]} : vector<64x128xf32> to vector<64x8xf32>
    %82 = vector.shape_cast %81 : vector<64x8xf32> to vector<8x8x8xf32>
    %c1_84 = arith.constant 1 : index
    %c1_85 = arith.constant 1 : index
    %c0_86 = arith.constant 0 : index
    %83 = vector.load %arg10[%c1_84, %c1_85, %c0_86] : memref<10x10x8xf32, #tpu.memory_space<vmem>>, vector<8x8x8xf32>
    tpu.vector_store %arg10[%c1_84, %c1_85, %c0_86], %82 {strides = array<i32>} : memref<10x10x8xf32, #tpu.memory_space<vmem>>, vector<8x8x8xf32>,
    %c0_87 = arith.constant 0 : index
    %c0_88 = arith.constant 0 : index
    %c0_89 = arith.constant 0 : index
    %84 = vector.load %arg10[%c0_87, %c0_88, %c0_89] : memref<10x10x8xf32, #tpu.memory_space<vmem>>, vector<8x8x8xf32>
    %85 = vector.shape_cast %84 : vector<8x8x8xf32> to vector<64x8xf32>
    %86 = arith.truncf %85 : vector<64x8xf32> to vector<64x8xbf16>
    %c0_90 = arith.constant 0 : index
    %c0_91 = arith.constant 0 : index
    %87 = vector.load %arg11[%c0_90, %c0_91] : memref<64x72xbf16, #tpu.memory_space<vmem>>, vector<64x8xbf16>
    tpu.vector_store %arg11[%c0_90, %c0_91], %86 {strides = array<i32>} : memref<64x72xbf16, #tpu.memory_space<vmem>>, vector<64x8xbf16>,
    %c0_92 = arith.constant 0 : index
    %c1_93 = arith.constant 1 : index
    %c0_94 = arith.constant 0 : index
    %88 = vector.load %arg10[%c0_92, %c1_93, %c0_94] : memref<10x10x8xf32, #tpu.memory_space<vmem>>, vector<8x8x8xf32>
    %89 = vector.shape_cast %88 : vector<8x8x8xf32> to vector<64x8xf32>
    %90 = arith.truncf %89 : vector<64x8xf32> to vector<64x8xbf16>
    %c0_95 = arith.constant 0 : index
    %c8_96 = arith.constant 8 : index
    %91 = vector.load %arg11[%c0_95, %c8_96] : memref<64x72xbf16, #tpu.memory_space<vmem>>, vector<64x8xbf16>
    tpu.vector_store %arg11[%c0_95, %c8_96], %90 {strides = array<i32>} : memref<64x72xbf16, #tpu.memory_space<vmem>>, vector<64x8xbf16>,
    %c0_97 = arith.constant 0 : index
    %c2_98 = arith.constant 2 : index
    %c0_99 = arith.constant 0 : index
    %92 = vector.load %arg10[%c0_97, %c2_98, %c0_99] : memref<10x10x8xf32, #tpu.memory_space<vmem>>, vector<8x8x8xf32>
    %93 = vector.shape_cast %92 : vector<8x8x8xf32> to vector<64x8xf32>
    %94 = arith.truncf %93 : vector<64x8xf32> to vector<64x8xbf16>
    %c0_100 = arith.constant 0 : index
    %c16_101 = arith.constant 16 : index
    %95 = vector.load %arg11[%c0_100, %c16_101] : memref<64x72xbf16, #tpu.memory_space<vmem>>, vector<64x8xbf16>
    tpu.vector_store %arg11[%c0_100, %c16_101], %94 {strides = array<i32>} : memref<64x72xbf16, #tpu.memory_space<vmem>>, vector<64x8xbf16>,
    %c1_102 = arith.constant 1 : index
    %c0_103 = arith.constant 0 : index
    %c0_104 = arith.constant 0 : index
    %96 = vector.load %arg10[%c1_102, %c0_103, %c0_104] : memref<10x10x8xf32, #tpu.memory_space<vmem>>, vector<8x8x8xf32>
    %97 = vector.shape_cast %96 : vector<8x8x8xf32> to vector<64x8xf32>
    %98 = arith.truncf %97 : vector<64x8xf32> to vector<64x8xbf16>
    %c0_105 = arith.constant 0 : index
    %c24_106 = arith.constant 24 : index
    %99 = vector.load %arg11[%c0_105, %c24_106] : memref<64x72xbf16, #tpu.memory_space<vmem>>, vector<64x8xbf16>
    tpu.vector_store %arg11[%c0_105, %c24_106], %98 {strides = array<i32>} : memref<64x72xbf16, #tpu.memory_space<vmem>>, vector<64x8xbf16>,
    %c1_107 = arith.constant 1 : index
    %c1_108 = arith.constant 1 : index
    %c0_109 = arith.constant 0 : index
    %100 = vector.load %arg10[%c1_107, %c1_108, %c0_109] : memref<10x10x8xf32, #tpu.memory_space<vmem>>, vector<8x8x8xf32>
    %101 = vector.shape_cast %100 : vector<8x8x8xf32> to vector<64x8xf32>
    %102 = arith.truncf %101 : vector<64x8xf32> to vector<64x8xbf16>
    %c0_110 = arith.constant 0 : index
    %c32_111 = arith.constant 32 : index
    %103 = vector.load %arg11[%c0_110, %c32_111] : memref<64x72xbf16, #tpu.memory_space<vmem>>, vector<64x8xbf16>
    tpu.vector_store %arg11[%c0_110, %c32_111], %102 {strides = array<i32>} : memref<64x72xbf16, #tpu.memory_space<vmem>>, vector<64x8xbf16>,
    %c1_112 = arith.constant 1 : index
    %c2_113 = arith.constant 2 : index
    %c0_114 = arith.constant 0 : index
    %104 = vector.load %arg10[%c1_112, %c2_113, %c0_114] : memref<10x10x8xf32, #tpu.memory_space<vmem>>, vector<8x8x8xf32>
    %105 = vector.shape_cast %104 : vector<8x8x8xf32> to vector<64x8xf32>
    %106 = arith.truncf %105 : vector<64x8xf32> to vector<64x8xbf16>
    %c0_115 = arith.constant 0 : index
    %c40_116 = arith.constant 40 : index
    %107 = vector.load %arg11[%c0_115, %c40_116] : memref<64x72xbf16, #tpu.memory_space<vmem>>, vector<64x8xbf16>
    tpu.vector_store %arg11[%c0_115, %c40_116], %106 {strides = array<i32>} : memref<64x72xbf16, #tpu.memory_space<vmem>>, vector<64x8xbf16>,
    %c2_117 = arith.constant 2 : index
    %c0_118 = arith.constant 0 : index
    %c0_119 = arith.constant 0 : index
    %108 = vector.load %arg10[%c2_117, %c0_118, %c0_119] : memref<10x10x8xf32, #tpu.memory_space<vmem>>, vector<8x8x8xf32>
    %109 = vector.shape_cast %108 : vector<8x8x8xf32> to vector<64x8xf32>
    %110 = arith.truncf %109 : vector<64x8xf32> to vector<64x8xbf16>
    %c0_120 = arith.constant 0 : index
    %c48_121 = arith.constant 48 : index
    %111 = vector.load %arg11[%c0_120, %c48_121] : memref<64x72xbf16, #tpu.memory_space<vmem>>, vector<64x8xbf16>
    tpu.vector_store %arg11[%c0_120, %c48_121], %110 {strides = array<i32>} : memref<64x72xbf16, #tpu.memory_space<vmem>>, vector<64x8xbf16>,
    %c2_122 = arith.constant 2 : index
    %c1_123 = arith.constant 1 : index
    %c0_124 = arith.constant 0 : index
    %112 = vector.load %arg10[%c2_122, %c1_123, %c0_124] : memref<10x10x8xf32, #tpu.memory_space<vmem>>, vector<8x8x8xf32>
    %113 = vector.shape_cast %112 : vector<8x8x8xf32> to vector<64x8xf32>
    %114 = arith.truncf %113 : vector<64x8xf32> to vector<64x8xbf16>
    %c0_125 = arith.constant 0 : index
    %c56_126 = arith.constant 56 : index
    %115 = vector.load %arg11[%c0_125, %c56_126] : memref<64x72xbf16, #tpu.memory_space<vmem>>, vector<64x8xbf16>
    tpu.vector_store %arg11[%c0_125, %c56_126], %114 {strides = array<i32>} : memref<64x72xbf16, #tpu.memory_space<vmem>>, vector<64x8xbf16>,
    %c2_127 = arith.constant 2 : index
    %c2_128 = arith.constant 2 : index
    %c0_129 = arith.constant 0 : index
    %116 = vector.load %arg10[%c2_127, %c2_128, %c0_129] : memref<10x10x8xf32, #tpu.memory_space<vmem>>, vector<8x8x8xf32>
    %117 = vector.shape_cast %116 : vector<8x8x8xf32> to vector<64x8xf32>
    %118 = arith.truncf %117 : vector<64x8xf32> to vector<64x8xbf16>
    %c0_130 = arith.constant 0 : index
    %c64_131 = arith.constant 64 : index
    %119 = vector.load %arg11[%c0_130, %c64_131] : memref<64x72xbf16, #tpu.memory_space<vmem>>, vector<64x8xbf16>
    tpu.vector_store %arg11[%c0_130, %c64_131], %118 {strides = array<i32>} : memref<64x72xbf16, #tpu.memory_space<vmem>>, vector<64x8xbf16>,
    %c0_132 = arith.constant 0 : index
    %c0_133 = arith.constant 0 : index
    %120 = vector.load %arg11[%c0_132, %c0_133] : memref<64x72xbf16, #tpu.memory_space<vmem>>, vector<64x72xbf16>
    %c0_134 = arith.constant 0 : index
    %c0_135 = arith.constant 0 : index
    %121 = vector.load %arg4[%c0_134, %c0_135] : memref<72x128xbf16, #tpu.memory_space<vmem>>, vector<72x128xbf16>
    %cst_136 = arith.constant dense<0.000000e+00> : vector<64x128xf32>
    %122 = tpu.matmul %120, %121, %cst_136 {dimension_numbers = #tpu.dot_dimension_numbers<[1], [0], [0], [1], [0, 0, 1, 1], [], []>} : vector<64x72xbf16>, vector<72x128xbf16>, vector<64x128xf32> -> vector<64x128xf32>
    %c0_137 = arith.constant 0 : index
    %c0_138 = arith.constant 0 : index
    %123 = vector.load %arg7[%c0_137, %c0_138] : memref<1x128xf32, #tpu.memory_space<vmem>>, vector<1x128xf32>
    %124 = vector.broadcast %123 : vector<1x128xf32> to vector<64x128xf32>
    %125 = arith.addf %122, %124 : vector<64x128xf32>
    %126 = arith.addf %125, %29 : vector<64x128xf32>
    %c2_139 = arith.constant 2 : index
    %c0_140 = arith.constant 0 : index
    %127 = memref.load %arg8[%c2_139, %c0_140] : memref<3x1xf32, #tpu.memory_space<smem>>
    %cst_141 = arith.constant 0.000000e+00 : f32
    %128 = vector.broadcast %cst_141 : f32 to vector<64x128xf32>
    %129 = arith.cmpf oge, %126, %128 : vector<64x128xf32>
    %130 = vector.broadcast %127 : f32 to vector<64x128xf32>
    %131 = arith.mulf %130, %126 : vector<64x128xf32>
    %132 = arith.select %129, %126, %131 : vector<64x128xi1>, vector<64x128xf32>
    %c0_142 = arith.constant 0 : index
    %c0_143 = arith.constant 0 : index
    %c0_144 = arith.constant 0 : index
    %133 = vector.load %arg9[%c0_142, %c0_143, %c0_144] : memref<1x64x128xf32, #tpu.memory_space<vmem>>, vector<1x64x128xf32>
    %134 = vector.shape_cast %133 : vector<1x64x128xf32> to vector<64x128xf32>
    %135 = vector.shape_cast %132 : vector<64x128xf32> to vector<1x64x128xf32>
    tpu.vector_store %arg9[%c0_142, %c0_143, %c0_144], %135 {strides = array<i32>} : memref<1x64x128xf32, #tpu.memory_space<vmem>>, vector<1x64x128xf32>,
    return
  }
  func.func @transform_0(%arg0: i32) -> (i32, i32, i32, i32, i32) {
    %c0_i32 = arith.constant 0 : i32
    %c0_i32_0 = arith.constant 0 : i32
    %c0_i32_1 = arith.constant 0 : i32
    %c0_i32_2 = arith.constant 0 : i32
    %c0_i32_3 = arith.constant 0 : i32
    return %arg0, %c0_i32, %c0_i32_0, %c0_i32_1, %c0_i32_2 : i32, i32, i32, i32, i32
  }
  func.func @transform_1(%arg0: i32) -> (i32, i32, i32) {
    %c0_i32 = arith.constant 0 : i32
    %c0_i32_0 = arith.constant 0 : i32
    %c0_i32_1 = arith.constant 0 : i32
    %c0_i32_2 = arith.constant 0 : i32
    return %c0_i32, %c0_i32_0, %c0_i32_1 : i32, i32, i32
  }
  func.func @transform_2(%arg0: i32) -> (i32, i32) {
    %c0_i32 = arith.constant 0 : i32
    %c0_i32_0 = arith.constant 0 : i32
    %c0_i32_1 = arith.constant 0 : i32
    return %c0_i32, %c0_i32_0 : i32, i32
  }
  func.func @transform_3(%arg0: i32) -> (i32, i32) {
    %c0_i32 = arith.constant 0 : i32
    %c0_i32_0 = arith.constant 0 : i32
    %c0_i32_1 = arith.constant 0 : i32
    return %c0_i32, %c0_i32_0 : i32, i32
  }
  func.func @transform_4(%arg0: i32) -> (i32, i32) {
    %c0_i32 = arith.constant 0 : i32
    %c0_i32_0 = arith.constant 0 : i32
    %c0_i32_1 = arith.constant 0 : i32
    return %c0_i32, %c0_i32_0 : i32, i32
  }
  func.func @transform_5(%arg0: i32) -> (i32, i32) {
    %c0_i32 = arith.constant 0 : i32
    %c0_i32_0 = arith.constant 0 : i32
    %c0_i32_1 = arith.constant 0 : i32
    return %c0_i32, %c0_i32_0 : i32, i32
  }
  func.func @transform_6(%arg0: i32) -> (i32, i32) {
    %c0_i32 = arith.constant 0 : i32
    %c0_i32_0 = arith.constant 0 : i32
    %c0_i32_1 = arith.constant 0 : i32
    return %c0_i32, %c0_i32_0 : i32, i32
  }
  func.func @transform_7(%arg0: i32) -> (i32, i32) {
    %c0_i32 = arith.constant 0 : i32
    %c0_i32_0 = arith.constant 0 : i32
    %c0_i32_1 = arith.constant 0 : i32
    return %c0_i32, %c0_i32_0 : i32, i32
  }
  func.func @transform_8(%arg0: i32) -> (i32, i32, i32) {
    %c0_i32 = arith.constant 0 : i32
    %c0_i32_0 = arith.constant 0 : i32
    %c0_i32_1 = arith.constant 0 : i32
    return %arg0, %c0_i32, %c0_i32_0 : i32, i32, i32
  }
}

</mosaic_0001>

<bundles_post_ra>
// kernel: downblock_forward.1
= control target key start
LH: loop header
LB: loop body
LE: loop exit
PB: predicated region body
PF: predicated region fallthrough
CT: control target
= control target key end

     0   :  { %s3114_s0 = inlined_call_operand.hbm [shape: bf16[2,8,2,8,8], index: 0, kind: input, shape index: {}]   ;;  %s3115_s1 = inlined_call_operand.hbm [shape: bf16[2,8,128], index: 1, kind: input, shape index: {}]   ;;  %s3116_s2 = inlined_call_operand.hbm [shape: bf16[72,128], index: 2, kind: input, shape index: {}]   ;;  %s3117_s3 = inlined_call_operand.hbm [shape: bf16[72,128], index: 3, kind: input, shape index: {}]   ;;  %s3118_s4 = inlined_call_operand.hbm [shape: f32[1,128], index: 4, kind: input, shape index: {}]   ;;  %s3119_s5 = inlined_call_operand.hbm [shape: f32[1,128], index: 5, kind: input, shape index: {}]   ;;  %s3120_s6 = inlined_call_operand.hbm [shape: f32[1,128], index: 6, kind: input, shape index: {}]   ;;  %s3121_s7 = inlined_call_operand.hbm [shape: f32[3,1], index: 7, kind: input, shape index: {}]   ;;  %s3122_s8 = inlined_call_operand.hbm [shape: f32[2,64,128], index: 8, kind: output, shape index: {}]  }
   0x1   :  { %3129 = sst [smem:[#allocation25_spill]] %s3115_s1 }
   0x2   :  { %13 = vsyncpa [#allocation5], 0 }
   0x3   :  { %15 = vsyncpa [#allocation5 + $0x1], 0 }
   0x4   :  { %16 = vsyncpa [#allocation9], 0 }
   0x5   :  { %17 = vsyncpa [#allocation12], 0 }
   0x6   :  { %18 = vsyncpa [#allocation15], 0 }
   0x7   :  { %19 = vsyncpa [#allocation7], 0 }
   0x8   :  { %20 = vsyncpa [#allocation6], 0 }
   0x9   :  { %22 = vsyncpa [#allocation6 + $0x1], 0  ;;  %s2438_s27 = smov 0   ;;  %s2440_s28 = smov 0  }
   0xa   :  { %s2442_s29 = smov 0   ;;  %s2444_s30 = smov 0  }
   0xb LB: > { %s2372_s9 = smov [#allocation8]   ;;  %s2459_s11 = sadd.s32 4294967295, %s2370_s30   ;;  %s2370_s30 = sphi %s2444_s30, %s3156_s30   ;;  %s2366_s29 = sphi %s2442_s29, %s3155_s29   ;;  %s2362_s28 = sphi %s2440_s28, %s3154_s28   ;;  %s2358_s27 = sphi %s2438_s27, %s3153_s27  }
   0xc   : > { %s244_s10 = sshll.u32 %s2372_s9, 4  ;;  %p1758_p0 = scmp.ge.s32.totalorder %s2370_s30, 1  ;;  %s2464_s10 = int_to_ptr.vmem [resolvable:$true] %s244_s10 }
   0xd   : > { %p3125_p1 = scmp.eq.s32.totalorder %s2459_s11, 0  ;;  %p232_p2 = scmp.lt.s32.totalorder %s2370_s30, 3 }
   0xe   : > { %s2373_s13 = smov [#allocation11]   ;;  %s2374_s16 = smov [#allocation14]  }
   0xf   : > { %p2466_p3 = pnand %p1758_p0, %p232_p2  ;;  %s270_s14 = sshll.u32 %s2373_s13, 4  ;;  %s2479_s14 = int_to_ptr.vmem [resolvable:$true] %s270_s14 }
  0x10   : > { %s295_s17 = sshll.u32 %s2374_s16, 4  ;;  %s3132_s1 = sld [smem:[#allocation25_spill]]  ;;  %s2481_s17 = int_to_ptr.vmem [resolvable:$true] %s295_s17 }
  0x11   : > { %s3130_s12 = scalar_select %p2466_p3, 1, 0 }
  0x12   : > { %p1962_p5 = pneg %p2466_p3 }
  0x14   : > { %p2475_p6 = pnand %p1962_p5, %p3125_p1 }
  0x16   : > { %s2077_s20 = scalar_lea.hbm %s3132_s1, 128  ;;  %p2491_p8 = pneg %p2475_p6 }
  0x17   : > { %p2078_p7 = scmp.ne.s32.totalorder %s3132_s1, %s2077_s20  ;;  %p2084_p11 = scmp.lt.u32.totalorder %s2077_s20, %s3132_s1 }
  0x19   : > { %p2080_p9 = pnand %p2491_p8, %p2078_p7 }
  0x1b   : > { %p2081_p10 = pneg %p2080_p9 }
  0x1d   : > { %p2086_p12 = pnand %p2084_p11, %p2081_p10 }
  0x1f   : > { %2089 = shalt.err (!%p2086_p12)
}
  0x20   : > { %s2090_s26 = scalar_lea.vmem %s2464_s10, 128  ;;  %p2098_p5 = scmp.lt.s32.totalorder %s2464_s10, %s2464_s10 }
  0x21   : > { %p2091_p13 = scmp.ne.s32.totalorder %s2464_s10, %s2090_s26  ;;  %p2099_p4 = scmp.lt.s32.totalorder %s2090_s26, %s2090_s26 }
  0x23   : > { %p2093_p0 = pnand %p2091_p13, %p2491_p8  ;;  %p2100_p7 = por %p2099_p4, %p2098_p5 }
  0x25   : > { %p2094_p2 = pneg %p2093_p0 }
  0x27   : > { %p2101_p9 = pnand %p2100_p7, %p2094_p2 }
  0x29   : > { %2104 = shalt.err (!%p2101_p9)
}
  0x2a   : > { %s3123_s9 = smov 64   ;;  %s3127_s13 = smov 4  }
  0x2b   : > { %1965 = dma.hbm_to_vmem [thread:$0]  (!%p2475_p6), %s3132_s1, 128, %s2464_s10, [#allocation9], %s3123_s9, %s3123_s9, %s3127_s13  }
  0x2c   : > { %s2105_s21 = scalar_lea.hbm %s3117_s3, 576 }
  0x2d   : > { %p2106_p4 = scmp.ne.s32.totalorder %s3117_s3, %s2105_s21  ;;  %p2112_p12 = scmp.lt.u32.totalorder %s2105_s21, %s3117_s3 }
  0x2f   : > { %p2108_p10 = pnand %p2106_p4, %p2491_p8 }
  0x31   : > { %p2109_p11 = pneg %p2108_p10 }
  0x33   : > { %p2114_p13 = pnand %p2112_p12, %p2109_p11 }
  0x35   : > { %2117 = shalt.err (!%p2114_p13)
}
  0x36   : > { %s2118_s10 = scalar_lea.vmem %s2479_s14, 576  ;;  %p2126_p7 = scmp.lt.s32.totalorder %s2479_s14, %s2479_s14 }
  0x37   : > { %p2119_p0 = scmp.ne.s32.totalorder %s2479_s14, %s2118_s10  ;;  %p2127_p9 = scmp.lt.s32.totalorder %s2118_s10, %s2118_s10 }
  0x39   : > { %p2121_p2 = pnand %p2119_p0, %p2491_p8  ;;  %p2128_p4 = por %p2127_p9, %p2126_p7 }
  0x3b   : > { %p2122_p5 = pneg %p2121_p2 }
  0x3d   : > { %p2129_p10 = pnand %p2128_p4, %p2122_p5 }
  0x3f   : > { %2132 = shalt.err (!%p2129_p10)
}
  0x40   : > { %1971 = dma.hbm_to_vmem [thread:$0]  (!%p2475_p6), %s3117_s3, 576, %s2479_s14, [#allocation12], %s3123_s9, %s3123_s9, %s3127_s13  }
  0x41   : > { %s2133_s21 = scalar_lea.hbm %s3119_s5, 16 }
  0x42   : > { %p2134_p11 = scmp.ne.s32.totalorder %s3119_s5, %s2133_s21  ;;  %p2140_p0 = scmp.lt.u32.totalorder %s2133_s21, %s3119_s5 }
  0x44   : > { %p2136_p12 = pnand %p2134_p11, %p2491_p8 }
  0x46   : > { %p2137_p13 = pneg %p2136_p12 }
  0x48   : > { %p2142_p2 = pnand %p2140_p0, %p2137_p13 }
  0x4a   : > { %2145 = shalt.err (!%p2142_p2)
}
  0x4b   : > { %s2146_s14 = scalar_lea.vmem %s2481_s17, 16  ;;  %s2153_s10 = scalar_lea.vmem %s2481_s17, 32 }
  0x4c   : > { %p2147_p5 = scmp.ne.s32.totalorder %s2481_s17, %s2146_s14  ;;  %p2154_p4 = scmp.lt.s32.totalorder %s2481_s17, %s2481_s17 }
  0x4d   : > { %p2155_p10 = scmp.lt.s32.totalorder %s2153_s10, %s2146_s14 }
  0x4e   : > { %p2149_p7 = pnand %p2147_p5, %p2491_p8 }
  0x4f   : > { %p2156_p11 = por %p2155_p10, %p2154_p4 }
  0x50   : > { %p2150_p9 = pneg %p2149_p7 }
  0x52   : > { %p2157_p12 = pnand %p2156_p11, %p2150_p9 }
  0x54   : > { %2160 = shalt.err (!%p2157_p12)
}
  0x55   : > { %1977 = dma.hbm_to_vmem [thread:$0]  (!%p2475_p6), %s3119_s5, 16, %s2481_s17, [#allocation15]  }
  0x56   : > { %s2377_s19 = smov [#allocation10]   ;;  %s2378_s21 = smov [#allocation13]  }
  0x57   : > { %s257_s20 = sshll.u32 %s2377_s19, 4  ;;  %s284_s22 = sshll.u32 %s2378_s21, 4  ;;  %s258_s20 = int_to_ptr.vmem [resolvable:$true] %s257_s20  ;;  %s285_s22 = int_to_ptr.vmem [resolvable:$true] %s284_s22 }
  0x58   : > { %s2161_s26 = scalar_lea.hbm %s3116_s2, 576 }
  0x59   : > { %p2162_p13 = scmp.ne.s32.totalorder %s3116_s2, %s2161_s26  ;;  %p2168_p5 = scmp.lt.u32.totalorder %s2161_s26, %s3116_s2 }
  0x5b   : > { %p2164_p0 = pnand %p2162_p13, %p2491_p8 }
  0x5d   : > { %p2165_p2 = pneg %p2164_p0 }
  0x5f   : > { %p2170_p7 = pnand %p2168_p5, %p2165_p2 }
  0x61   : > { %2173 = shalt.err (!%p2170_p7)
}
  0x62   : > { %s2174_s17 = scalar_lea.vmem %s258_s20, 576  ;;  %p2182_p11 = scmp.lt.s32.totalorder %s258_s20, %s258_s20 }
  0x63   : > { %p2175_p9 = scmp.ne.s32.totalorder %s258_s20, %s2174_s17  ;;  %p2183_p12 = scmp.lt.s32.totalorder %s2174_s17, %s2174_s17 }
  0x65   : > { %p2177_p4 = pnand %p2175_p9, %p2491_p8  ;;  %p2184_p1 = por %p2183_p12, %p2182_p11 }
  0x67   : > { %p2178_p10 = pneg %p2177_p4 }
  0x69   : > { %p2185_p3 = pnand %p2184_p1, %p2178_p10 }
  0x6b   : > { %2188 = shalt.err (!%p2185_p3)
}
  0x6c   : > { %s3134_s18 = smov 64   ;;  %s2189_s25 = scalar_lea.hbm %s3118_s4, 16 }
  0x6d   : > { %1968 = dma.hbm_to_vmem [thread:$0]  (!%p2475_p6), %s3116_s2, 576, %s258_s20, [#allocation9], %s3134_s18, %s3134_s18, %s3127_s13  }
  0x6e   : > { %p2190_p1 = scmp.ne.s32.totalorder %s3118_s4, %s2189_s25  ;;  %p2196_p0 = scmp.lt.u32.totalorder %s2189_s25, %s3118_s4 }
  0x70   : > { %p2192_p3 = pnand %p2190_p1, %p2491_p8 }
  0x72   : > { %p2193_p13 = pneg %p2192_p3 }
  0x74   : > { %p2198_p2 = pnand %p2196_p0, %p2193_p13 }
  0x76   : > { %2201 = shalt.err (!%p2198_p2)
}
  0x77   : > { %s2202_s17 = scalar_lea.vmem %s285_s22, 16  ;;  %s2209_s20 = scalar_lea.vmem %s285_s22, 32 }
  0x78   : > { %p2203_p5 = scmp.ne.s32.totalorder %s285_s22, %s2202_s17  ;;  %p2210_p4 = scmp.lt.s32.totalorder %s285_s22, %s285_s22 }
  0x79   : > { %p2211_p10 = scmp.lt.s32.totalorder %s2209_s20, %s2202_s17 }
  0x7a   : > { %p2205_p7 = pnand %p2203_p5, %p2491_p8 }
  0x7b   : > { %p2212_p11 = por %p2211_p10, %p2210_p4 }
  0x7c   : > { %p2206_p9 = pneg %p2205_p7 }
  0x7e   : > { %p2213_p12 = pnand %p2212_p11, %p2206_p9 }
  0x80   : > { %2216 = shalt.err (!%p2213_p12)
}
  0x81   : > { %1974 = dma.hbm_to_vmem [thread:$0]  (!%p2475_p6), %s3118_s4, 16, %s285_s22, [#allocation12]  }
  0x82   : > { %s2379_s21 = smov [#allocation16]   ;;  %s2217_s14 = scalar_lea.hbm %s3120_s6, 16 }
  0x83   : > { %s306_s24 = sshll.u32 %s2379_s21, 4  ;;  %p2218_p1 = scmp.ne.s32.totalorder %s3120_s6, %s2217_s14  ;;  %s307_s24 = int_to_ptr.vmem [resolvable:$true] %s306_s24 }
  0x84   : > { %p2224_p0 = scmp.lt.u32.totalorder %s2217_s14, %s3120_s6 }
  0x85   : > { %p2220_p3 = pnand %p2218_p1, %p2491_p8 }
  0x87   : > { %p2221_p13 = pneg %p2220_p3 }
  0x89   : > { %p2226_p2 = pnand %p2224_p0, %p2221_p13 }
  0x8b   : > { %2229 = shalt.err (!%p2226_p2)
}
  0x8c   : > { %s2230_s22 = scalar_lea.vmem %s307_s24, 16  ;;  %s2237_s9 = scalar_lea.vmem %s307_s24, 32 }
  0x8d   : > { %p2231_p5 = scmp.ne.s32.totalorder %s307_s24, %s2230_s22  ;;  %p2238_p4 = scmp.lt.s32.totalorder %s307_s24, %s307_s24 }
  0x8e   : > { %p2239_p10 = scmp.lt.s32.totalorder %s2237_s9, %s2230_s22 }
  0x8f   : > { %p2233_p7 = pnand %p2231_p5, %p2491_p8 }
  0x90   : > { %p2240_p11 = por %p2239_p10, %p2238_p4 }
  0x91   : > { %p2234_p9 = pneg %p2233_p7 }
  0x93   : > { %p2241_p12 = pnand %p2240_p11, %p2234_p9 }
  0x95   : > { %2244 = shalt.err (!%p2241_p12)
}
  0x96   : > { %1980 = dma.hbm_to_vmem [thread:$0]  (!%p2475_p6), %s3120_s6, 16, %s307_s24, [#allocation15]  }
  0x97   : > { %s2245_s14 = scalar_lea.hbm %s3121_s7, 64 }
  0x98   : > { %p2246_p1 = scmp.ne.s32.totalorder %s3121_s7, %s2245_s14  ;;  %p2252_p0 = scmp.lt.u32.totalorder %s2245_s14, %s3121_s7 }
  0x9a   : > { %p2248_p3 = pnand %p2246_p1, %p2491_p8 }
  0x9c   : > { %p2249_p13 = pneg %p2248_p3 }
  0x9e   : > { %p2254_p2 = pnand %p2252_p0, %p2249_p13 }
  0xa0   : > { %2257 = shalt.err (!%p2254_p2)
}
  0xa1   : > { %s2380_s22 = smov [#allocation17]   ;;  %s1757_s23 = sadd.s32 4294967294, %s2370_s30  }
  0xa2   : > { %1983 = dma.hbm_to_smem (!%p2475_p6), %s3121_s7, 64, %s2380_s22, [#allocation7]  }
  0xa3   : > { %s2640_s15 = sadd.s32 1, %s2370_s30   ;;  %s35_s19 = sadd.s32 1, %s2366_s29 }
  0xa4   : > { %s32_s21 = ssub.s32 %s2370_s30, %s2640_s15  ;;  %p42_p8 = scmp.ne.s32.totalorder %s2366_s29, %s2362_s28 }
  0xa5   : > { %p33_p5 = scmp.eq.s32.totalorder %s32_s21, 0  ;;  %p43_p7 = scmp.eq.s32.totalorder %s2370_s30, 0 }
  0xa6   : > { %p48_p9 = scmp.ne.s32.totalorder %s2362_s28, %s2358_s27  ;;  %p219_p4 = scmp.eq.s32.totalorder %s2459_s11, 1 }
  0xa7   : > { %s2652_s25 = scalar_select %p33_p5, %s2366_s29, %s35_s19  }
  0xa8   : > { %p44_p10 = por %p43_p7, %p42_p8  ;;  %p3135_p11 = scmp.eq.s32.totalorder %s2459_s11, 0 }
  0xa9   : > { %p2660_p6 = por %p219_p4, %p42_p8  ;;  %p225_p1 = scmp.eq.s32.totalorder %s1757_s23, 1 }
  0xaa   : > { %p2656_p12 = por %p3135_p11, %p48_p9  ;;  %p1999_p3 = scmp.lt.s32.totalorder %s2370_s30, 2 }
  0xab   : > { %s3137_s14 = scalar_select %p2660_p6, 1, 0 }
  0xac   : > { %s326_s10 = sand.u32 1, %s2366_s29   ;;  %p2666_p13 = por %p225_p1, %p48_p9 }
  0xad   : > { %s1767_s17 = sshll.u32 %s326_s10, 6  ;;  %s1832_s20 = sshll.u32 %s2370_s30, 10 }
  0xae   : > { %s3138_s16 = scalar_select %p2666_p13, 1, 0 }
  0xaf   : > { %s2674_s9 = scalar_lea.hbm %s3114_s0, %s1832_s20  ;;  %s330_s19 = scalar_lea.vmem [#allocation4], %s1767_s17 }
  0xb0   : > { %s337_s21 = sshll.u32 %s330_s19, 4  ;;  %p2676_p0 = pnand %p1999_p3, %p44_p10  ;;  %s2680_s21 = int_to_ptr.vmem [resolvable:$true] %s337_s21 }
  0xb1   : > { %s2682_s13 = scalar_lea.sflag [#allocation5], %s326_s10  ;;  %s2258_s1 = scalar_lea.hbm %s2674_s9, 1024 }
  0xb2   : > { %p2259_p2 = scmp.ne.s32.totalorder %s2674_s9, %s2258_s1  ;;  %p2260_p8 = pneg %p2676_p0 }
  0xb3   : > { %s2263_s22 = scalar_lea.hbm %s3114_s0, 2048  ;;  %p2264_p9 = scmp.lt.u32.totalorder %s2674_s9, %s3114_s0 }
  0xb4   : > { %p2261_p5 = pnand %p2260_p8, %p2259_p2  ;;  %p2265_p4 = scmp.lt.u32.totalorder %s2263_s22, %s2258_s1 }
  0xb5   : > { %p2267_p11 = scmp.lt.u32.totalorder %s2258_s1, %s2674_s9 }
  0xb6   : > { %p2262_p7 = pneg %p2261_p5  ;;  %p2266_p10 = por %p2265_p4, %p2264_p9 }
  0xb8   : > { %p2268_p1 = por %p2267_p11, %p2266_p10 }
  0xba   : > { %p2269_p3 = pnand %p2268_p1, %p2262_p7 }
  0xbc   : > { %2272 = shalt.err (!%p2269_p3)
}
  0xbd   : > { %s2273_s10 = scalar_lea.vmem %s2680_s21, 1024  ;;  %s2381_s17 = smov [#allocation4]  }
  0xbe   : > { %p2274_p2 = scmp.ne.s32.totalorder %s2680_s21, %s2273_s10  ;;  %s2278_s20 = sshll.u32 %s2381_s17, 4  ;;  %s2279_s20 = int_to_ptr.vmem [resolvable:$false] %s2278_s20 }
  0xbf   : > { %s2280_s24 = scalar_lea.vmem %s2279_s20, 2048  ;;  %p2281_p6 = scmp.lt.s32.totalorder %s2680_s21, %s2279_s20 }
  0xc0   : > { %p2276_p5 = pnand %p2274_p2, %p2260_p8  ;;  %p2282_p9 = scmp.lt.s32.totalorder %s2280_s24, %s2273_s10 }
  0xc2   : > { %p2277_p13 = pneg %p2276_p5  ;;  %p2283_p4 = por %p2282_p9, %p2281_p6 }
  0xc4   : > { %p2284_p10 = pnand %p2283_p4, %p2277_p13 }
  0xc6   : > { %2287 = shalt.err (!%p2284_p10)
}
  0xc7   : > { %s3140_s1 = smov 4   ;;  %p3141_p8 = scmp.ne.s32.totalorder %s3130_s12, 0 }
  0xc8   : > { %1987 = dma.hbm_to_vmem [thread:$0]  (!%p2676_p0), %s2674_s9, 1024, %s2680_s21, %s2682_s13, %s3134_s18, %s3134_s18, %s3140_s1  }
  0xc9   : > { %349 = sbr.rel (%p3141_p8) target bundleno = 1272 (0x4f8), region = 52  ;;  %s2716_s22 = sand.u32 (!%p3141_p8), 1, %s2362_s28  }
  0xca   : > { %s1771_s19 = sshll.u32 (!%p3141_p8), %s2716_s22, 6  ;;  %s352_s10 = scalar_lea.sflag (!%p3141_p8), [#allocation5], %s2716_s22 }
  0xcb   : > { %s2722_s23 = scalar_lea.vmem (!%p3141_p8), [#allocation4], %s1771_s19 }
  0xd0   : > { %2333 = dma.done.wait (%p2656_p12), %s352_s10, 1024  }
  0xd1   : > { %2335 = vsyncadd (%p2656_p12), %s352_s10, 4294966272  ;;  %p3142_p6 = scmp.eq.s32.totalorder %s2459_s11, 0 }
  0xd3   : > { %2337 = dma.done.wait (%p3142_p6), [#allocation9], 704   ;;  %p3143_p13 = pmov %p3142_p6 }
  0xd4   : > { %p3144_p0 = pmov %p3142_p6 }
  0xd5   : > { %2339 = vsyncadd (%p3143_p13), [#allocation9], 4294966592 }
  0xd6   : > { %2341 = dma.done.wait (%p3144_p0), [#allocation12], 592   ;;  %p3145_p7 = pmov %p3144_p0 }
  0xd7   : > { %p3146_p11 = pmov %p3144_p0 }
  0xd8   : > { %2343 = vsyncadd (%p3145_p7), [#allocation12], 4294966704 }
  0xd9   : > { %2345 = dma.done.wait (%p3146_p11), [#allocation15], 32   ;;  %p3147_p1 = pmov %p3144_p0 }
  0xda   : > { %p3148_p12 = pmov %p3144_p0 }
  0xdb   : > { %2347 = vsyncadd (%p3147_p1), [#allocation15], 4294967264 }
  0xdc   : > { %2349 = dma.done.wait (%p3148_p12), [#allocation7], 64   ;;  %p3149_p3 = pmov %p3144_p0 }
  0xde   : > { %2351 = vsyncadd (%p3149_p3), [#allocation7], 4294967232 }
  0xdf   : > { %388 = sfence }
  0xe0   : > { %v465_v0 = vld [vmem:[#allocation8 + $0x4] sm:$0xf]  ;;  %vm498_vm0 = vcmask 1043456   ;;  %v463_v1 = vld [vmem:[#allocation8] sm:$0xf]  ;;  %vm418_vm1 = vcmask 64512  }
  0xe1   : > { %1926 = vmatprep.subr.msk.bf16.mxu1 %vm498_vm0, %v465_v0  ;;  %1927 = vmatprep.subr.msk.bf16.mxu0 %vm498_vm0, %v463_v1  ;;  %v500_v2 = vsel %vm498_vm0, %v465_v0, 0  ;;  %v600_v3 = vsel %vm498_vm0, %v463_v1, 0  ;;  %v2059_v4 = vld [vmem:[%s2722_s23 + $0x4] ss:$8 sps:$4 sm:$0xff]   ;;  %v2060_v5 = vld [vmem:[%s2722_s23] ss:$8 sps:$4 sm:$0xff]  }
  0xe2   : > { %1863 = vmatpush3.bf16.msra.mxu1 %v500_v2  ;;  %1873 = vmatpush3.bf16.msra.mxu0 %v600_v3  ;;  %v2061_v6 = vld [vmem:[%s2722_s23 + $0x14] ss:$8 sps:$4 sm:$0xff]   ;;  %v2062_v7 = vld [vmem:[%s2722_s23 + $0x10] ss:$8 sps:$4 sm:$0xff]   ;;  %v2063_v8 = vld [vmem:[%s2722_s23 + $0x24] ss:$8 sps:$4 sm:$0xff]  }
  0xe3   : > { %1864 = vmatprep.mubr.msk.bf16.mxu1 %vm418_vm1, %v2059_v4  ;;  %1874 = vmatprep.mubr.msk.bf16.mxu0 %vm418_vm1, %v2060_v5  ;;  %v2064_v9 = vld [vmem:[%s2722_s23 + $0x20] ss:$8 sps:$4 sm:$0xff]   ;;  %v2065_v10 = vld [vmem:[%s2722_s23 + $0x34] ss:$8 sps:$4 sm:$0xff]   ;;  %v2066_v11 = vld [vmem:[%s2722_s23 + $0x30] ss:$8 sps:$4 sm:$0xff]  }
  0xe4   : > { %vm420_vm2 = vcmask 58368   ;;  %vm425_vm3 = vcmask 57344   ;;  %v2382_v12 = vmov 0.0   ;;  %s682_s12 = sld [smem:[#allocation17]]  ;;  %v1804_v15 = vld [vmem:[#allocation13] ss:$0 sm:$0xff] }
  0xe5   : > { %1865 = vmatmul.mubr.msk.bf16.vlgmr.msra.gmra.mrb[0].mxu1 %vm418_vm1, %v2061_v6  ;;  %1875 = vmatmul.mubr.msk.bf16.vlgmr.msra.gmra.mrb[0].mxu0 %vm418_vm1, %v2062_v7  ;;  %419 = vst.msk [vmem:[#allocation2] sm:$0xff] %vm418_vm1, %v2382_v12  ;;  %423 = vst.msk [vmem:[#allocation2 + $0x90] sm:$0xff] %vm418_vm1, %v2382_v12  ;;  %s2383_s13 = smov 16   ;;  %s2384_s18 = smov 8   ;;  %vm761_vm12 = vcmask 130112   ;;  %vm794_vm13 = vcmask 195712  }
  0xe6   : > { %1868 = vmatprep.mubr.msk.bf16.mxu1 %vm418_vm1, %v2063_v8  ;;  %1878 = vmatprep.mubr.msk.bf16.mxu0 %vm418_vm1, %v2064_v9  ;;  %421 = vst.msk [vmem:[#allocation2 + $0x8] sm:$0x3] %vm420_vm2, %v2382_v12  ;;  %424 = vst.msk [vmem:[#allocation2 + $0x98] sm:$0x3] %vm420_vm2, %v2382_v12  ;;  %s2385_s26 = smov 24   ;;  %s2386_s9 = smov 32  }
  0xe7   : > { %437 = vst.msk [vmem:[#allocation2 + $0x19] sm:$0x1] %vm425_vm3, %v2382_v12  ;;  %427 = vst.msk [vmem:[#allocation2 + $0x10] sm:$0x1] %vm425_vm3, %v2382_v12  ;;  %s2387_s21 = smov 40   ;;  %s2388_s17 = smov 48  }
  0xe8   : > { %428 = vst.msk [vmem:[#allocation2 + $0x20] sm:$0x1] %vm425_vm3, %v2382_v12  ;;  %429 = vst.msk [vmem:[#allocation2 + $0x30] sm:$0x1] %vm425_vm3, %v2382_v12  ;;  %s2389_s20 = smov 56   ;;  %s2390_s24 = smov 64  }
  0xe9   : > { %430 = vst.msk [vmem:[#allocation2 + $0x40] sm:$0x1] %vm425_vm3, %v2382_v12  ;;  %431 = vst.msk [vmem:[#allocation2 + $0x50] sm:$0x1] %vm425_vm3, %v2382_v12  ;;  %vm827_vm14 = vcmask 261312   ;;  %vm860_vm15 = vcmask 326912  }
  0xea   : > { %432 = vst.msk [vmem:[#allocation2 + $0x60] sm:$0x1] %vm425_vm3, %v2382_v12  ;;  %433 = vst.msk [vmem:[#allocation2 + $0x70] sm:$0x1] %vm425_vm3, %v2382_v12  ;;  %v691_v20 = vstv %s682_s12  ;;  %vm893_vm2 = vcmask 392512   ;;  %s1815_s1 = sld [smem:[#allocation17 + $0x80]] }
  0xeb   : > { %434 = vst.msk [vmem:[#allocation2 + $0x80] sm:$0x1] %vm425_vm3, %v2382_v12  ;;  %438 = vst.msk [vmem:[#allocation2 + $0x29] sm:$0x1] %vm425_vm3, %v2382_v12  ;;  %s1826_s10 = sld [smem:[#allocation17 + $0x100]]  ;;  %s3048_s23 = scalar_lea.vmem [#allocation18], %s1771_s19 }
  0xec   : > { %439 = vst.msk [vmem:[#allocation2 + $0x39] sm:$0x1] %vm425_vm3, %v2382_v12  ;;  %440 = vst.msk [vmem:[#allocation2 + $0x49] sm:$0x1] %vm425_vm3, %v2382_v12  ;;  %s1833_s19 = sshll.u32 %s2459_s11, 10  ;;  %s1615_s12 = sshll.u32 %s3048_s23, 4  ;;  %s3067_s12 = int_to_ptr.vmem [resolvable:$true] %s1615_s12 }
  0xed   : > { %1869 = vmatmul.mubr.msk.bf16.gmra.mrb[4].mxu1 %vm418_vm1, %v2065_v10  ;;  %1879 = vmatmul.mubr.msk.bf16.gmra.mrb[4].mxu0 %vm418_vm1, %v2066_v11  ;;  %441 = vst.msk [vmem:[#allocation2 + $0x59] sm:$0x1] %vm425_vm3, %v2382_v12  ;;  %442 = vst.msk [vmem:[#allocation2 + $0x69] sm:$0x1] %vm425_vm3, %v2382_v12  ;;  %v2804_v58 = vld [vmem:[#allocation2 + $0x1] sm:$0xff]  ;;  %s3064_s11 = scalar_lea.hbm %s3122_s8, %s1833_s19  ;;  %p3150_p5 = scmp.ne.s32.totalorder %s3137_s14, 0 }
  0xee   : > { %443 = vst.msk [vmem:[#allocation2 + $0x79] sm:$0x1] %vm425_vm3, %v2382_v12  ;;  %444 = vst.msk [vmem:[#allocation2 + $0x89] sm:$0x1] %vm425_vm3, %v2382_v12 }
  0xef   : > { %436 = vst.msk [vmem:[#allocation2 + $0x9] sm:$0x1] %vm425_vm3, %v2382_v12  ;;  %426 = vst.msk [vmem:[#allocation2] sm:$0x1] %vm425_vm3, %v2382_v12 }
  0xf0   : > { %445 = vst.msk [vmem:[#allocation2 + $0x99] sm:$0x1] %vm425_vm3, %v2382_v12  ;;  %435 = vst.msk [vmem:[#allocation2 + $0x90] sm:$0x1] %vm425_vm3, %v2382_v12  ;;  %vm927_vm3 = vcmask 458112  }
  0xf6   : > { %v2802_v57 = vld [vmem:[#allocation2 + $0x2] sm:$0xff] }
  0xf7   : > { %v2806_v59 = vld [vmem:[#allocation2] sm:$0xff] }
 0x1b8   : > { %v1866_v13 = vpop.f32.mrb[0].mxu1  ;;  %v1876_v14 = vpop.f32.mrb[0].mxu0 }
 0x1b9   : > { %v536_v16 = vpop.f32.mrb[1].mxu1  ;;  %v645_v17 = vadd.f32 %v1876_v14, %v1866_v13  ;;  %v636_v18 = vpop.f32.mrb[1].mxu0 }
 0x1ba   : > { %v1867_v19 = vpop.f32.mrb[2].mxu1  ;;  %v637_v21 = vadd.f32 %v636_v18, %v536_v16  ;;  %v1877_v22 = vpop.f32.mrb[2].mxu0 }
 0x1bb   : > { %v539_v23 = vpop.f32.mrb[3].mxu1  ;;  %v676_v24 = vadd.f32 %v1804_v15, %v645_v17  ;;  %v648_v25 = vadd.f32 %v1877_v22, %v1867_v19  ;;  %v639_v26 = vpop.f32.mrb[3].mxu0 }
 0x1bc   : > { %v674_v27 = vadd.f32 %v1804_v15, %v637_v21  ;;  %v640_v28 = vadd.f32 %v639_v26, %v539_v23 }
 0x1bd   : > { %vm685_vm4 = vcmp.ge.f32.partialorder %v676_v24, 0.0  ;;  %v694_v29 = vmul.f32 %v691_v20, %v676_v24  ;;  %v677_v30 = vadd.f32 %v1804_v15, %v648_v25 }
 0x1be   : > { %vm683_vm5 = vcmp.ge.f32.partialorder %v674_v27, 0.0  ;;  %v692_v31 = vmul.f32 %v691_v20, %v674_v27  ;;  %v675_v32 = vadd.f32 %v1804_v15, %v640_v28 }
 0x1bf   : > { %v2786_v33 = vsel %vm685_vm4, %v676_v24, %v694_v29  ;;  %vm686_vm6 = vcmp.ge.f32.partialorder %v677_v30, 0.0  ;;  %v695_v34 = vmul.f32 %v691_v20, %v677_v30  ;;  %v2067_v24 = vld [vmem:[#allocation10] sm:$0xff]   ;;  %v2068_v29 = vld [vmem:[#allocation10 + $0x8] sm:$0xff]   ;;  %vm960_vm4 = vcmask 523712  }
 0x1c0   : > { %v1870_v35 = vpop.f32.mrb[4].mxu1  ;;  %711 = vst.msk [vmem:[#allocation2 + $0x31] sm:$0xff] %vm418_vm1, %v2786_v33  ;;  %v2790_v36 = vsel %vm683_vm5, %v674_v27, %v692_v31  ;;  %vm684_vm7 = vcmp.ge.f32.partialorder %v675_v32, 0.0  ;;  %v693_v37 = vmul.f32 %v691_v20, %v675_v32  ;;  %v1880_v38 = vpop.f32.mrb[4].mxu0  ;;  %1882 = vmatprep.subr.bf16.mxu1 %v2067_v24  ;;  %vm993_vm5 = vcmask 589312  }
 0x1c1   : > { %v552_v39 = vpop.f32.mrb[5].mxu1  ;;  %709 = vst.msk [vmem:[#allocation2 + $0x11] sm:$0xff] %vm418_vm1, %v2790_v36  ;;  %v2794_v40 = vsel %vm686_vm6, %v677_v30, %v695_v34  ;;  %v661_v41 = vadd.f32 %v1880_v38, %v1870_v35  ;;  %v652_v42 = vpop.f32.mrb[5].mxu0  ;;  %1883 = vmatpush3.bf16.msra.mxu1 %v2067_v24  ;;  %v2069_v34 = vld [vmem:[#allocation10 + $0x10] sm:$0xff]   ;;  %v2070_v35 = vld [vmem:[#allocation10 + $0x18] sm:$0xff]   ;;  %vm1045_vm6 = vcmask 588800  }
 0x1c2   : > { %v1871_v43 = vpop.f32.mrb[6].mxu1  ;;  %712 = vst.msk [vmem:[#allocation2 + $0x41] sm:$0xff] %vm418_vm1, %v2794_v40  ;;  %v2798_v44 = vsel %vm684_vm7, %v675_v32, %v693_v37  ;;  %v653_v45 = vadd.f32 %v652_v42, %v552_v39  ;;  %v1881_v46 = vpop.f32.mrb[6].mxu0  ;;  %1884 = vmatprep.subr.bf16.mxu1 %v2068_v29  ;;  %v2071_v39 = vld [vmem:[#allocation10 + $0x20] ss:$0 sps:$4 sm:$0xff]  }
 0x1c3   : > { %v555_v47 = vpop.f32.mrb[7].mxu1  ;;  %710 = vst.msk [vmem:[#allocation2 + $0x21] sm:$0xff] %vm418_vm1, %v2798_v44  ;;  %v680_v48 = vadd.f32 %v1804_v15, %v661_v41  ;;  %v664_v49 = vadd.f32 %v1881_v46, %v1871_v43  ;;  %v655_v50 = vpop.f32.mrb[7].mxu0  ;;  %v1059_v41 = vsel %vm498_vm0, %v2071_v39, 0 }
 0x1c4   : > { %v678_v51 = vadd.f32 %v1804_v15, %v653_v45  ;;  %v656_v52 = vadd.f32 %v655_v50, %v555_v47 }
 0x1c5   : > { %vm689_vm8 = vcmp.ge.f32.partialorder %v680_v48, 0.0  ;;  %v698_v53 = vmul.f32 %v691_v20, %v680_v48  ;;  %v681_v54 = vadd.f32 %v1804_v15, %v664_v49  ;;  %1885 = vmatpush3.bf16.msra.mxu1 %v2068_v29 }
 0x1c6   : > { %vm687_vm9 = vcmp.ge.f32.partialorder %v678_v51, 0.0  ;;  %v696_v55 = vmul.f32 %v691_v20, %v678_v51  ;;  %v679_v56 = vadd.f32 %v1804_v15, %v656_v52  ;;  %1886 = vmatprep.subr.bf16.mxu1 %v2069_v34 }
 0x1c7   : > { %v2808_v60 = vsel %vm689_vm8, %v680_v48, %v698_v53  ;;  %vm690_vm10 = vcmp.ge.f32.partialorder %v681_v54, 0.0  ;;  %v699_v61 = vmul.f32 %v691_v20, %v681_v54  ;;  %v801_v11 = vld [vmem:[#allocation2 + $0x30] sm:$0xff] }
 0x1c8   : > { %715 = vst.msk [vmem:[#allocation2 + $0x71] sm:$0xff] %vm418_vm1, %v2808_v60  ;;  %v2812_v62 = vsel %vm687_vm9, %v678_v51, %v696_v55  ;;  %vm688_vm11 = vcmp.ge.f32.partialorder %v679_v56, 0.0  ;;  %v697_v63 = vmul.f32 %v691_v20, %v679_v56  ;;  %v767_v0 = vld [vmem:[#allocation2 + $0x12] sm:$0xff] }
 0x1c9   : > { %v734_v1 = vld [vmem:[#allocation2 + $0x11] sm:$0xff]  ;;  %713 = vst.msk [vmem:[#allocation2 + $0x51] sm:$0xff] %vm418_vm1, %v2812_v62  ;;  %v2816_v3 = vsel %vm690_vm10, %v681_v54, %v699_v61  ;;  %v774_v4 = vpack.c.bf16 %v767_v0, %v2802_v57  ;;  %v802_v8 = vld [vmem:[#allocation2 + $0x40] sm:$0xff]  ;;  %1887 = vmatpush3.bf16.msra.mxu1 %v2069_v34 }
 0x1ca   : > { %v799_v2 = vld [vmem:[#allocation2 + $0x10] sm:$0xff]  ;;  %v741_v5 = vpack.c.bf16 %v734_v1, %v2804_v58  ;;  %716 = vst.msk [vmem:[#allocation2 + $0x81] sm:$0xff] %vm418_vm1, %v2816_v3  ;;  %v2823_v7 = vsel %vm688_vm11, %v679_v56, %v697_v63  ;;  %v735_v9 = vld [vmem:[#allocation2 + $0x21] sm:$0xff]  ;;  %v808_v14 = vpack.c.bf16 %v802_v8, %v801_v11  ;;  %1888 = vmatprep.subr.bf16.mxu1 %v2070_v35 }
 0x1cb   : > { %v725_v6 = vpack.c.bf16 %v799_v2, %v2806_v59  ;;  %v800_v10 = vld [vmem:[#allocation2 + $0x20] sm:$0xff]  ;;  %714 = vst.msk [vmem:[#allocation2 + $0x61] sm:$0xff] %vm418_vm1, %v2823_v7  ;;  %782 = vrot.lane.b32.xlu1 %v774_v4, %s2383_s13  ;;  %v736_v12 = vld [vmem:[#allocation2 + $0x31] sm:$0xff]  ;;  %v840_v28 = vpack.c.bf16 %v735_v9, %v734_v1 }
 0x1cc   : > { %749 = vrot.lane.b32.xlu0 %v741_v5, %s2384_s18  ;;  %v907_v13 = vpack.c.bf16 %v801_v11, %v800_v10  ;;  %v742_v15 = vpack.c.bf16 %v736_v12, %v735_v9  ;;  %v835_v16 = vld [vmem:[#allocation2 + $0x41] sm:$0xff]  ;;  %v807_v19 = vpack.c.bf16 %v800_v10, %v799_v2  ;;  %v867_v25 = vld [vmem:[#allocation2 + $0x32] sm:$0xff] }
 0x1cd   : > { %729 = vst.msk [vmem:[#allocation3] sm:$0xff] %vm418_vm1, %v725_v6  ;;  %v841_v18 = vpack.c.bf16 %v835_v16, %v736_v12  ;;  %v868_v22 = vld [vmem:[#allocation2 + $0x42] sm:$0xff]  ;;  %1889 = vmatpush3.bf16.msra.mxu1 %v2070_v35  ;;  %v2864_v54 = vld [vmem:[#allocation2 + $0x90] sm:$0xff] }
 0x1ce   : > { %730 = vst.msk [vmem:[#allocation3 + $0x8] sm:$0xff] %vm418_vm1, %v907_v13  ;;  %v874_v27 = vpack.c.bf16 %v868_v22, %v867_v25  ;;  %v768_v30 = vld [vmem:[#allocation2 + $0x22] sm:$0xff]  ;;  %1928 = vmatprep.subr.msk.bf16.mxu1 %vm498_vm0, %v2071_v39  ;;  %v2873_v4 = vld [vmem:[#allocation2 + $0x91] sm:$0xff] }
 0x1cf   : > { %817 = vrot.lane.b32.xlu1 %v808_v14, %s2385_s26  ;;  %v805_v21 = vld [vmem:[#allocation2 + $0x70] sm:$0xff]  ;;  %v775_v31 = vpack.c.bf16 %v867_v25, %v768_v30  ;;  %v873_v32 = vpack.c.bf16 %v768_v30, %v767_v0 }
 0x1d0   : > { %751 = vrot.lane.b32.xlu0 %v742_v15, %s2384_s18  ;;  %v2833_v17 = vld [vmem:[#allocation2 + $0x50] sm:$0xff] }
 0x1d1   : > { %v908_v20 = vpack.c.bf16 %v2833_v17, %v802_v8  ;;  %v935_v37 = vld [vmem:[#allocation2 + $0x51] sm:$0xff]  ;;  %v806_v42 = vld [vmem:[#allocation2 + $0x80] sm:$0xff]  ;;  %1891 = vmatpush3.bf16.msra.mxu1 %v1059_v41 }
 0x1d2   : > { %v2836_v23 = vld [vmem:[#allocation2 + $0x60] sm:$0xff]  ;;  %v941_v38 = vpack.c.bf16 %v935_v37, %v835_v16  ;;  %v968_v43 = vld [vmem:[#allocation2 + $0x52] sm:$0xff]  ;;  %v810_v45 = vpack.c.bf16 %v806_v42, %v805_v21  ;;  %v910_v56 = vpack.c.bf16 %v2864_v54, %v806_v42 }
 0x1d3   : > { %850 = vrot.lane.b32.xlu1 %v841_v18, %s2386_s9  ;;  %731 = vst.msk [vmem:[#allocation3 + $0x10] sm:$0xff] %vm418_vm1, %v908_v20  ;;  %v2842_v26 = vpack.c.bf16 %v805_v21, %v2836_v23  ;;  %v974_v46 = vpack.c.bf16 %v968_v43, %v868_v22  ;;  %v838_v47 = vld [vmem:[#allocation2 + $0x71] sm:$0xff]  ;;  %v839_v48 = vld [vmem:[#allocation2 + $0x81] sm:$0xff]  ;;  %v809_v53 = vpack.c.bf16 %v2836_v23, %v2833_v17 }
 0x1d4   : > { %815 = vrot.lane.b32.xlu0 %v807_v19, %s2385_s26  ;;  %v843_v49 = vpack.c.bf16 %v839_v48, %v838_v47  ;;  %v871_v50 = vld [vmem:[#allocation2 + $0x72] sm:$0xff]  ;;  %v872_v51 = vld [vmem:[#allocation2 + $0x82] sm:$0xff]  ;;  %v943_v5 = vpack.c.bf16 %v2873_v4, %v839_v48 }
 0x1d5   : > { %732 = vst.msk [vmem:[#allocation3 + $0x18] sm:$0xff] %vm418_vm1, %v2842_v26  ;;  %v876_v52 = vpack.c.bf16 %v872_v51, %v871_v50  ;;  %v837_v55 = vld [vmem:[#allocation2 + $0x61] sm:$0xff]  ;;  %v2879_v6 = vld [vmem:[#allocation2 + $0x92] sm:$0xff] }
 0x1d6   : > { %v842_v61 = vpack.c.bf16 %v837_v55, %v935_v37  ;;  %v870_v63 = vld [vmem:[#allocation2 + $0x62] sm:$0xff]  ;;  %v744_v0 = vpack.c.bf16 %v838_v47, %v837_v55  ;;  %v976_v8 = vpack.c.bf16 %v2879_v6, %v872_v51  ;;  %v2924_v51 = vstv %s1815_s1 }
 0x1d7   : > { %883 = vrot.lane.b32.xlu1 %v874_v27, %s2387_s21  ;;  %v875_v1 = vpack.c.bf16 %v870_v63, %v968_v43  ;;  %v777_v2 = vpack.c.bf16 %v871_v50, %v870_v63 }
 0x1d8   : > { %848 = vrot.lane.b32.xlu0 %v840_v28, %s2386_s9 }
 0x1db   : > { %784 = vrot.lane.b32.xlu1 %v775_v31, %s2383_s13 }
 0x1dc   : > { %881 = vrot.lane.b32.xlu0 %v873_v32, %s2387_s21 }
 0x1df   : > { %917 = vrot.lane.b32.xlu1 %v908_v20, %s2388_s17 }
 0x1e0   : > { %915 = vrot.lane.b32.xlu0 %v907_v13, %s2388_s17 }
 0x1e3   : > { %950 = vrot.lane.b32.xlu1 %v941_v38, %s2389_s20 }
 0x1e4   : > { %948 = vrot.lane.b32.xlu0 %v742_v15, %s2389_s20 }
 0x1e7   : > { %753 = vrot.lane.b32.xlu1 %v941_v38, %s2384_s18 }
 0x1e8   : > { %981 = vrot.lane.b32.xlu0 %v775_v31, %s2390_s24 }
 0x1eb   : > { %821 = vrot.lane.b32.xlu1 %v810_v45, %s2385_s26 }
 0x1ec   : > { %983 = vrot.lane.b32.xlu0 %v974_v46, %s2390_s24 }
 0x1ef   : > { %854 = vrot.lane.b32.xlu1 %v843_v49, %s2386_s9  ;;  %v2922_v49 = vld [vmem:[#allocation14] ss:$0 sm:$0xff] }
 0x1f0   : > { %786 = vrot.lane.b32.xlu0 %v974_v46, %s2383_s13 }
 0x1f3   : > { %887 = vrot.lane.b32.xlu1 %v876_v52, %s2387_s21 }
 0x1f4   : > { %819 = vrot.lane.b32.xlu0 %v809_v53, %s2385_s26 }
 0x1f7   : > { %921 = vrot.lane.b32.xlu1 %v910_v56, %s2388_s17 }
 0x1f8   : > { %852 = vrot.lane.b32.xlu0 %v842_v61, %s2386_s9 }
 0x1fb   : > { %755 = vrot.lane.b32.xlu1 %v744_v0, %s2384_s18 }
 0x1fc   : > { %885 = vrot.lane.b32.xlu0 %v875_v1, %s2387_s21 }
 0x1ff   : > { %788 = vrot.lane.b32.xlu1 %v777_v2, %s2383_s13 }
 0x200   : > { %919 = vrot.lane.b32.xlu0 %v2842_v26, %s2388_s17 }
 0x203   : > { %954 = vrot.lane.b32.xlu1 %v943_v5, %s2389_s20 }
 0x204   : > { %952 = vrot.lane.b32.xlu0 %v744_v0, %s2389_s20 }
 0x207   : > { %987 = vrot.lane.b32.xlu1 %v976_v8, %s2390_s24 }
 0x208   : > { %985 = vrot.lane.b32.xlu0 %v777_v2, %s2390_s24 }
 0x23d   : > { %v783_v9 = vpop.permute.xlu1 %782 }
 0x23e   : > { %v750_v10 = vpop.permute.xlu0 %749 }
 0x23f   : > { %762 = vst.msk [vmem:[#allocation3] sm:$0xff] %vm761_vm12, %v750_v10 }
 0x240   : > { %795 = vst.msk [vmem:[#allocation3] sm:$0xff] %vm794_vm13, %v783_v9 }
 0x241   : > { %v818_v11 = vpop.permute.xlu1 %817 }
 0x242   : > { %v752_v12 = vpop.permute.xlu0 %751 }
 0x243   : > { %763 = vst.msk [vmem:[#allocation3 + $0x8] sm:$0xff] %vm761_vm12, %v752_v12 }
 0x245   : > { %v851_v13 = vpop.permute.xlu1 %850 }
 0x246   : > { %v816_v14 = vpop.permute.xlu0 %815 }
 0x247   : > { %828 = vst.msk [vmem:[#allocation3] sm:$0xff] %vm827_vm14, %v816_v14 }
 0x249   : > { %v884_v15 = vpop.permute.xlu1 %883 }
 0x24a   : > { %v849_v16 = vpop.permute.xlu0 %848 }
 0x24b   : > { %861 = vst.msk [vmem:[#allocation3] sm:$0xff] %vm860_vm15, %v849_v16 }
 0x24d   : > { %v785_v17 = vpop.permute.xlu1 %784 }
 0x24e   : > { %v882_v18 = vpop.permute.xlu0 %881  ;;  %796 = vst.msk [vmem:[#allocation3 + $0x8] sm:$0xff] %vm794_vm13, %v785_v17 }
 0x24f   : > { %894 = vst.msk [vmem:[#allocation3] sm:$0xff] %vm893_vm2, %v882_v18 }
 0x250   : > { %829 = vst.msk [vmem:[#allocation3 + $0x8] sm:$0xff] %vm827_vm14, %v818_v11 }
 0x251   : > { %862 = vst.msk [vmem:[#allocation3 + $0x8] sm:$0xff] %vm860_vm15, %v851_v13  ;;  %v918_v19 = vpop.permute.xlu1 %917 }
 0x252   : > { %895 = vst.msk [vmem:[#allocation3 + $0x8] sm:$0xff] %vm893_vm2, %v884_v15  ;;  %v916_v20 = vpop.permute.xlu0 %915 }
 0x253   : > { %929 = vst.msk [vmem:[#allocation3 + $0x8] sm:$0xff] %vm927_vm3, %v918_v19  ;;  %928 = vst.msk [vmem:[#allocation3] sm:$0xff] %vm927_vm3, %v916_v20 }
 0x255   : > { %v951_v21 = vpop.permute.xlu1 %950 }
 0x256   : > { %v949_v22 = vpop.permute.xlu0 %948  ;;  %962 = vst.msk [vmem:[#allocation3 + $0x8] sm:$0xff] %vm960_vm4, %v951_v21 }
 0x257   : > { %961 = vst.msk [vmem:[#allocation3] sm:$0xff] %vm960_vm4, %v949_v22 }
 0x259   : > { %v754_v23 = vpop.permute.xlu1 %753 }
 0x25a   : > { %v982_v24 = vpop.permute.xlu0 %981  ;;  %764 = vst.msk [vmem:[#allocation3 + $0x10] sm:$0xff] %vm761_vm12, %v754_v23 }
 0x25b   : > { %994 = vst.msk [vmem:[#allocation3] sm:$0xff] %vm993_vm5, %v982_v24 }
 0x25d   : > { %v822_v25 = vpop.permute.xlu1 %821 }
 0x25e   : > { %v984_v26 = vpop.permute.xlu0 %983 }
 0x25f   : > { %995 = vst.msk [vmem:[#allocation3 + $0x8] sm:$0xff] %vm993_vm5, %v984_v26 }
 0x261   : > { %v855_v27 = vpop.permute.xlu1 %854 }
 0x262   : > { %v787_v28 = vpop.permute.xlu0 %786  ;;  %v998_v29 = vld [vmem:[#allocation3] sm:$0xff] }
 0x263   : > { %797 = vst.msk [vmem:[#allocation3 + $0x10] sm:$0xff] %vm794_vm13, %v787_v28  ;;  %1892 = vmatprep.mubr.msk.bf16.mxu1 %vm1045_vm6, %v998_v29 }
 0x265   : > { %v888_v30 = vpop.permute.xlu1 %887 }
 0x266   : > { %v820_v31 = vpop.permute.xlu0 %819  ;;  %v999_v32 = vld [vmem:[#allocation3 + $0x8] sm:$0xff] }
 0x267   : > { %830 = vst.msk [vmem:[#allocation3 + $0x10] sm:$0xff] %vm827_vm14, %v820_v31  ;;  %1893 = vmatmul.mubr.msk.bf16.vlgmr.msra.gmra.mrb[8].mxu1 %vm1045_vm6, %v999_v32 }
 0x269   : > { %v922_v34 = vpop.permute.xlu1 %921 }
 0x26a   : > { %v853_v35 = vpop.permute.xlu0 %852 }
 0x26b   : > { %863 = vst.msk [vmem:[#allocation3 + $0x10] sm:$0xff] %vm860_vm15, %v853_v35 }
 0x26d   : > { %v756_v37 = vpop.permute.xlu1 %755 }
 0x26e   : > { %v886_v38 = vpop.permute.xlu0 %885  ;;  %765 = vst.msk [vmem:[#allocation3 + $0x18] sm:$0xff] %vm761_vm12, %v756_v37 }
 0x26f   : > { %896 = vst.msk [vmem:[#allocation3 + $0x10] sm:$0xff] %vm893_vm2, %v886_v38 }
 0x271   : > { %v789_v39 = vpop.permute.xlu1 %788 }
 0x272   : > { %v920_v41 = vpop.permute.xlu0 %919  ;;  %798 = vst.msk [vmem:[#allocation3 + $0x18] sm:$0xff] %vm794_vm13, %v789_v39 }
 0x273   : > { %930 = vst.msk [vmem:[#allocation3 + $0x10] sm:$0xff] %vm927_vm3, %v920_v41 }
 0x274   : > { %831 = vst.msk [vmem:[#allocation3 + $0x18] sm:$0xff] %vm827_vm14, %v822_v25 }
 0x275   : > { %864 = vst.msk [vmem:[#allocation3 + $0x18] sm:$0xff] %vm860_vm15, %v855_v27  ;;  %v955_v42 = vpop.permute.xlu1 %954 }
 0x276   : > { %897 = vst.msk [vmem:[#allocation3 + $0x18] sm:$0xff] %vm893_vm2, %v888_v30  ;;  %v953_v43 = vpop.permute.xlu0 %952  ;;  %v2072_v30 = vld [vmem:[#allocation11] sm:$0xff]  }
 0x277   : > { %931 = vst.msk [vmem:[#allocation3 + $0x18] sm:$0xff] %vm927_vm3, %v922_v34  ;;  %1900 = vmatprep.subr.bf16.mxu0 %v2072_v30  ;;  %v2073_v34 = vld [vmem:[#allocation11 + $0x8] sm:$0xff]  }
 0x278   : > { %963 = vst.msk [vmem:[#allocation3 + $0x10] sm:$0xff] %vm960_vm4, %v953_v43  ;;  %964 = vst.msk [vmem:[#allocation3 + $0x18] sm:$0xff] %vm960_vm4, %v955_v42  ;;  %1901 = vmatpush3.bf16.msra.mxu0 %v2072_v30 }
 0x279   : > { %v988_v45 = vpop.permute.xlu1 %987  ;;  %1902 = vmatprep.subr.bf16.mxu0 %v2073_v34 }
 0x27a   : > { %v986_v46 = vpop.permute.xlu0 %985  ;;  %997 = vst.msk [vmem:[#allocation3 + $0x18] sm:$0xff] %vm993_vm5, %v988_v45 }
 0x27b   : > { %996 = vst.msk [vmem:[#allocation3 + $0x10] sm:$0xff] %vm993_vm5, %v986_v46 }
 0x27c   : > { %1903 = vmatpush3.bf16.msra.mxu0 %v2073_v34 }
 0x281   : > { %v1001_v48 = vld [vmem:[#allocation3 + $0x18] sm:$0xff] }
 0x282   : > { %v1000_v47 = vld [vmem:[#allocation3 + $0x10] sm:$0xff] }
 0x283   : > { %1896 = vmatprep.mubr.msk.bf16.mxu1 %vm1045_vm6, %v1000_v47 }
 0x284   : > { %1897 = vmatmul.mubr.msk.bf16.gmra.mrb[12].mxu1 %vm1045_vm6, %v1001_v48 }
 0x33a   : > { %v1894_v50 = vpop.f32.mrb[8].mxu1 }
 0x33b   : > { %v1104_v52 = vadd.f32 %v1894_v50, %v2922_v49  ;;  %v1095_v53 = vpop.f32.mrb[9].mxu1 }
 0x33c   : > { %v1096_v55 = vadd.f32 %v2922_v49, %v1095_v53  ;;  %v1895_v56 = vpop.f32.mrb[10].mxu1 }
 0x33d   : > { %vm1129_vm7 = vcmp.ge.f32.partialorder %v1104_v52, 0.0  ;;  %v1138_v61 = vmul.f32 %v2924_v51, %v1104_v52  ;;  %v1107_v63 = vadd.f32 %v1895_v56, %v2922_v49  ;;  %v1098_v0 = vpop.f32.mrb[11].mxu1 }
 0x33e   : > { %vm1127_vm8 = vcmp.ge.f32.partialorder %v1096_v55, 0.0  ;;  %v1136_v1 = vmul.f32 %v2924_v51, %v1096_v55  ;;  %v1099_v2 = vadd.f32 %v2922_v49, %v1098_v0  ;;  %v2075_v0 = vld [vmem:[#allocation11 + $0x18] sm:$0xff]  }
 0x33f   : > { %v1146_v5 = vsel %vm1129_vm7, %v1104_v52, %v1138_v61  ;;  %vm1130_vm9 = vcmp.ge.f32.partialorder %v1107_v63, 0.0  ;;  %v1139_v8 = vmul.f32 %v2924_v51, %v1107_v63  ;;  %v2074_v52 = vld [vmem:[#allocation11 + $0x10] sm:$0xff]  }
 0x340   : > { %1154 = vst.msk [vmem:[#allocation2 + $0x31] sm:$0xff] %vm418_vm1, %v1146_v5  ;;  %v1144_v9 = vsel %vm1127_vm8, %v1096_v55, %v1136_v1  ;;  %vm1128_vm10 = vcmp.ge.f32.partialorder %v1099_v2, 0.0  ;;  %v1137_v10 = vmul.f32 %v2924_v51, %v1099_v2  ;;  %1904 = vmatprep.subr.bf16.mxu0 %v2074_v52 }
 0x341   : > { %1152 = vst.msk [vmem:[#allocation2 + $0x11] sm:$0xff] %vm418_vm1, %v1144_v9  ;;  %v1147_v11 = vsel %vm1130_vm9, %v1107_v63, %v1139_v8  ;;  %1905 = vmatpush3.bf16.msra.mxu0 %v2074_v52 }
 0x342   : > { %1155 = vst.msk [vmem:[#allocation2 + $0x41] sm:$0xff] %vm418_vm1, %v1147_v11  ;;  %v1145_v12 = vsel %vm1128_vm10, %v1099_v2, %v1137_v10  ;;  %1906 = vmatprep.subr.bf16.mxu0 %v2075_v0  ;;  %v2076_v11 = vld [vmem:[#allocation11 + $0x20] ss:$0 sps:$4 sm:$0xff]  }
 0x343   : > { %1153 = vst.msk [vmem:[#allocation2 + $0x21] sm:$0xff] %vm418_vm1, %v1145_v12 }
 0x345   : > { %1907 = vmatpush3.bf16.msra.mxu0 %v2075_v0 }
 0x346   : > { %1929 = vmatprep.subr.msk.bf16.mxu0 %vm498_vm0, %v2076_v11 }
 0x347   : > { %v1242_v16 = vld [vmem:[#allocation2 + $0x30] sm:$0xff] }
 0x348   : > { %v1177_v13 = vld [vmem:[#allocation2 + $0x11] sm:$0xff] }
 0x349   : > { %v1240_v14 = vld [vmem:[#allocation2 + $0x10] sm:$0xff]  ;;  %v1184_v15 = vpack.c.bf16 %v1177_v13, %v2804_v58  ;;  %v2939_v17 = vld [vmem:[#allocation2 + $0x40] sm:$0xff] }
 0x34a   : > { %v1168_v18 = vpack.c.bf16 %v1240_v14, %v2806_v59  ;;  %v1249_v19 = vpack.c.bf16 %v2939_v17, %v1242_v16  ;;  %v1209_v20 = vld [vmem:[#allocation2 + $0x12] sm:$0xff]  ;;  %v1241_v21 = vld [vmem:[#allocation2 + $0x20] sm:$0xff] }
 0x34b   : > { %1192 = vrot.lane.b32.xlu0 %v1184_v15, %s2384_s18  ;;  %v2944_v22 = vld [vmem:[#allocation2 + $0x41] sm:$0xff]  ;;  %v1344_v23 = vpack.c.bf16 %v1242_v16, %v1241_v21  ;;  %v1216_v58 = vpack.c.bf16 %v1209_v20, %v2802_v57  ;;  %v1274_v24 = vld [vmem:[#allocation2 + $0x31] sm:$0xff]  ;;  %v1248_v26 = vpack.c.bf16 %v1241_v21, %v1240_v14  ;;  %v1492_v14 = vsel %vm498_vm0, %v2076_v11, 0 }
 0x34c   : > { %1172 = vst.msk [vmem:[#allocation3] sm:$0xff] %vm418_vm1, %v1168_v18  ;;  %1258 = vrot.lane.b32.xlu1 %v1249_v19, %s2385_s26  ;;  %v1281_v25 = vpack.c.bf16 %v2944_v22, %v1274_v24  ;;  %v2952_v59 = vld [vmem:[#allocation2 + $0x42] sm:$0xff]  ;;  %v1306_v27 = vld [vmem:[#allocation2 + $0x32] sm:$0xff]  ;;  %1909 = vmatpush3.bf16.msra.mxu0 %v1492_v14 }
 0x34d   : > { %1173 = vst.msk [vmem:[#allocation3 + $0x8] sm:$0xff] %vm418_vm1, %v1344_v23  ;;  %v1313_v28 = vpack.c.bf16 %v2952_v59, %v1306_v27  ;;  %v1273_v29 = vld [vmem:[#allocation2 + $0x21] sm:$0xff] }
 0x34e   : > { %v1280_v57 = vpack.c.bf16 %v1273_v29, %v1177_v13  ;;  %v1185_v31 = vpack.c.bf16 %v1274_v24, %v1273_v29  ;;  %v1305_v32 = vld [vmem:[#allocation2 + $0x22] sm:$0xff] }
 0x34f   : > { %1224 = vrot.lane.b32.xlu0 %v1216_v58, %s2383_s13  ;;  %v1312_v42 = vpack.c.bf16 %v1305_v32, %v1209_v20  ;;  %v1217_v47 = vpack.c.bf16 %v1306_v27, %v1305_v32 }
 0x350   : > { %1290 = vrot.lane.b32.xlu1 %v1281_v25, %s2386_s9 }
 0x353   : > { %1256 = vrot.lane.b32.xlu0 %v1248_v26, %s2385_s26 }
 0x354   : > { %1322 = vrot.lane.b32.xlu1 %v1313_v28, %s2387_s21 }
 0x357   : > { %v1898_v35 = vpop.f32.mrb[12].mxu1  ;;  %1288 = vrot.lane.b32.xlu0 %v1280_v57, %s2386_s9 }
 0x358   : > { %v1120_v37 = vadd.f32 %v1898_v35, %v2922_v49  ;;  %v1111_v38 = vpop.f32.mrb[13].mxu1  ;;  %1194 = vrot.lane.b32.xlu1 %v1185_v31, %s2384_s18 }
 0x359   : > { %v1112_v39 = vadd.f32 %v2922_v49, %v1111_v38  ;;  %v1899_v41 = vpop.f32.mrb[14].mxu1 }
 0x35a   : > { %vm1133_vm11 = vcmp.ge.f32.partialorder %v1120_v37, 0.0  ;;  %v1142_v43 = vmul.f32 %v2924_v51, %v1120_v37  ;;  %v1123_v45 = vadd.f32 %v1899_v41, %v2922_v49  ;;  %v1114_v46 = vpop.f32.mrb[15].mxu1 }
 0x35b   : > { %vm1131_vm7 = vcmp.ge.f32.partialorder %v1112_v39, 0.0  ;;  %v1140_v48 = vmul.f32 %v2924_v51, %v1112_v39  ;;  %v1115_v50 = vadd.f32 %v2922_v49, %v1114_v46  ;;  %1320 = vrot.lane.b32.xlu0 %v1312_v42, %s2387_s21 }
 0x35c   : > { %v1150_v53 = vsel %vm1133_vm11, %v1120_v37, %v1142_v43  ;;  %vm1134_vm8 = vcmp.ge.f32.partialorder %v1123_v45, 0.0  ;;  %v1143_v55 = vmul.f32 %v2924_v51, %v1123_v45  ;;  %1226 = vrot.lane.b32.xlu1 %v1217_v47, %s2383_s13 }
 0x35d   : > { %1158 = vst.msk [vmem:[#allocation2 + $0x71] sm:$0xff] %vm418_vm1, %v1150_v53  ;;  %v1148_v56 = vsel %vm1131_vm7, %v1112_v39, %v1140_v48  ;;  %vm1132_vm9 = vcmp.ge.f32.partialorder %v1115_v50, 0.0  ;;  %v1141_v61 = vmul.f32 %v2924_v51, %v1115_v50 }
 0x35e   : > { %1156 = vst.msk [vmem:[#allocation2 + $0x51] sm:$0xff] %vm418_vm1, %v1148_v56  ;;  %v1151_v63 = vsel %vm1134_vm8, %v1123_v45, %v1143_v55 }
 0x35f   : > { %1159 = vst.msk [vmem:[#allocation2 + $0x81] sm:$0xff] %vm418_vm1, %v1151_v63  ;;  %v1149_v49 = vsel %vm1132_vm9, %v1115_v50, %v1141_v61  ;;  %1352 = vrot.lane.b32.xlu0 %v1344_v23, %s2388_s17 }
 0x360   : > { %1157 = vst.msk [vmem:[#allocation2 + $0x61] sm:$0xff] %vm418_vm1, %v1149_v49 }
 0x363   : > { %1384 = vrot.lane.b32.xlu0 %v1185_v31, %s2389_s20 }
 0x364   : > { %v1246_v9 = vld [vmem:[#allocation2 + $0x70] sm:$0xff] }
 0x365   : > { %v1339_v1 = vld [vmem:[#allocation2 + $0x50] sm:$0xff] }
 0x366   : > { %v1345_v51 = vpack.c.bf16 %v1339_v1, %v2939_v17  ;;  %v1403_v2 = vld [vmem:[#allocation2 + $0x52] sm:$0xff]  ;;  %v1247_v15 = vld [vmem:[#allocation2 + $0x80] sm:$0xff] }
 0x367   : > { %1416 = vrot.lane.b32.xlu0 %v1217_v47, %s2390_s24  ;;  %v1371_v5 = vld [vmem:[#allocation2 + $0x51] sm:$0xff]  ;;  %v1245_v8 = vld [vmem:[#allocation2 + $0x60] sm:$0xff]  ;;  %v1409_v12 = vpack.c.bf16 %v1403_v2, %v2952_v59  ;;  %v1251_v17 = vpack.c.bf16 %v1247_v15, %v1246_v9  ;;  %v1347_v26 = vpack.c.bf16 %v2864_v54, %v1247_v15 }
 0x368   : > { %1354 = vrot.lane.b32.xlu1 %v1345_v51, %s2388_s17  ;;  %v1346_v10 = vpack.c.bf16 %v1246_v9, %v1245_v8  ;;  %1174 = vst.msk [vmem:[#allocation3 + $0x10] sm:$0xff] %vm418_vm1, %v1345_v51  ;;  %v1377_v13 = vpack.c.bf16 %v1371_v5, %v2944_v22  ;;  %v1250_v16 = vpack.c.bf16 %v1245_v8, %v1339_v1  ;;  %v1277_v18 = vld [vmem:[#allocation2 + $0x61] sm:$0xff]  ;;  %v1278_v21 = vld [vmem:[#allocation2 + $0x71] sm:$0xff] }
 0x369   : > { %v1279_v19 = vld [vmem:[#allocation2 + $0x81] sm:$0xff]  ;;  %v1282_v20 = vpack.c.bf16 %v1277_v18, %v1371_v5  ;;  %v1310_v25 = vld [vmem:[#allocation2 + $0x72] sm:$0xff]  ;;  %v1378_v27 = vpack.c.bf16 %v1278_v21, %v1277_v18 }
 0x36a   : > { %1175 = vst.msk [vmem:[#allocation3 + $0x18] sm:$0xff] %vm418_vm1, %v1346_v10  ;;  %v1283_v22 = vpack.c.bf16 %v1279_v19, %v1278_v21  ;;  %v1309_v23 = vld [vmem:[#allocation2 + $0x62] sm:$0xff]  ;;  %v1379_v29 = vpack.c.bf16 %v2873_v4, %v1279_v19 }
 0x36b   : > { %1418 = vrot.lane.b32.xlu0 %v1409_v12, %s2390_s24  ;;  %v1311_v58 = vld [vmem:[#allocation2 + $0x82] sm:$0xff]  ;;  %v1314_v24 = vpack.c.bf16 %v1309_v23, %v1403_v2  ;;  %v1410_v28 = vpack.c.bf16 %v1310_v25, %v1309_v23 }
 0x36c   : > { %1386 = vrot.lane.b32.xlu1 %v1377_v13, %s2389_s20  ;;  %v1315_v59 = vpack.c.bf16 %v1311_v58, %v1310_v25  ;;  %v1411_v54 = vpack.c.bf16 %v2879_v6, %v1311_v58 }
 0x36f   : > { %1228 = vrot.lane.b32.xlu0 %v1409_v12, %s2383_s13 }
 0x370   : > { %1196 = vrot.lane.b32.xlu1 %v1377_v13, %s2384_s18  ;;  %v1816_v13 = vld [vmem:[#allocation16] ss:$0 sm:$0xff] }
 0x373   : > { %1260 = vrot.lane.b32.xlu0 %v1250_v16, %s2385_s26 }
 0x374   : > { %1262 = vrot.lane.b32.xlu1 %v1251_v17, %s2385_s26  ;;  %v1576_v17 = vstv %s1826_s10 }
 0x377   : > { %1292 = vrot.lane.b32.xlu0 %v1282_v20, %s2386_s9 }
 0x378   : > { %1294 = vrot.lane.b32.xlu1 %v1283_v22, %s2386_s9  ;;  %s1602_s9 = scalar_lea.sflag [#allocation6], %s2716_s22 }
 0x37b   : > { %1324 = vrot.lane.b32.xlu0 %v1314_v24, %s2387_s21 }
 0x37c   : > { %1326 = vrot.lane.b32.xlu1 %v1315_v59, %s2387_s21  ;;  %s2288_s21 = scalar_lea.vmem %s3067_s12, 1024 }
 0x37d   : > { %p2289_p2 = scmp.ne.s32.totalorder %s3067_s12, %s2288_s21 }
 0x37f   : > { %1356 = vrot.lane.b32.xlu0 %v1346_v10, %s2388_s17  ;;  %p2290_p9 = pnand %p2289_p2, %p3150_p5 }
 0x380   : > { %1358 = vrot.lane.b32.xlu1 %v1347_v26, %s2388_s17  ;;  %s2391_s17 = smov [#allocation18]  }
 0x381   : > { %p2291_p4 = pneg %p2290_p9 }
 0x383   : > { %1388 = vrot.lane.b32.xlu0 %v1378_v27, %s2389_s20 }
 0x384   : > { %1198 = vrot.lane.b32.xlu1 %v1378_v27, %s2384_s18 }
 0x387   : > { %1420 = vrot.lane.b32.xlu0 %v1410_v28, %s2390_s24 }
 0x388   : > { %1230 = vrot.lane.b32.xlu1 %v1410_v28, %s2383_s13 }
 0x38c   : > { %1390 = vrot.lane.b32.xlu1 %v1379_v29, %s2389_s20  ;;  %s2292_s20 = sshll.u32 %s2391_s17, 4  ;;  %s2293_s20 = int_to_ptr.vmem [resolvable:$false] %s2292_s20 }
 0x38d   : > { %p2295_p10 = scmp.lt.s32.totalorder %s3067_s12, %s2293_s20 }
 0x390   : > { %1422 = vrot.lane.b32.xlu1 %v1411_v54, %s2390_s24  ;;  %s2294_s24 = scalar_lea.vmem %s2293_s20, 2048 }
 0x391   : > { %p2296_p8 = scmp.lt.s32.totalorder %s2294_s24, %s2288_s21 }
 0x393   : > { %p2297_p6 = por %p2296_p8, %p2295_p10 }
 0x395   : > { %p2298_p13 = pnand %p2297_p6, %p2291_p4 }
 0x3bd   : > { %v1193_v30 = vpop.permute.xlu0 %1192 }
 0x3be   : > { %1204 = vst.msk [vmem:[#allocation3] sm:$0xff] %vm761_vm12, %v1193_v30  ;;  %v1259_v57 = vpop.permute.xlu1 %1258 }
 0x3c1   : > { %v1225_v31 = vpop.permute.xlu0 %1224 }
 0x3c2   : > { %1236 = vst.msk [vmem:[#allocation3] sm:$0xff] %vm794_vm13, %v1225_v31  ;;  %v1291_v32 = vpop.permute.xlu1 %1290 }
 0x3c5   : > { %v1257_v34 = vpop.permute.xlu0 %1256 }
 0x3c6   : > { %1268 = vst.msk [vmem:[#allocation3] sm:$0xff] %vm827_vm14, %v1257_v34  ;;  %v1323_v35 = vpop.permute.xlu1 %1322 }
 0x3c9   : > { %v1289_v37 = vpop.permute.xlu0 %1288 }
 0x3ca   : > { %1300 = vst.msk [vmem:[#allocation3] sm:$0xff] %vm860_vm15, %v1289_v37  ;;  %v1195_v4 = vpop.permute.xlu1 %1194 }
 0x3cb   : > { %1205 = vst.msk [vmem:[#allocation3 + $0x8] sm:$0xff] %vm761_vm12, %v1195_v4 }
 0x3cd   : > { %v1321_v6 = vpop.permute.xlu0 %1320 }
 0x3ce   : > { %1332 = vst.msk [vmem:[#allocation3] sm:$0xff] %vm893_vm2, %v1321_v6  ;;  %v1227_v38 = vpop.permute.xlu1 %1226 }
 0x3cf   : > { %1237 = vst.msk [vmem:[#allocation3 + $0x8] sm:$0xff] %vm794_vm13, %v1227_v38 }
 0x3d0   : > { %1269 = vst.msk [vmem:[#allocation3 + $0x8] sm:$0xff] %vm827_vm14, %v1259_v57 }
 0x3d1   : > { %1301 = vst.msk [vmem:[#allocation3 + $0x8] sm:$0xff] %vm860_vm15, %v1291_v32  ;;  %v1353_v39 = vpop.permute.xlu0 %1352 }
 0x3d2   : > { %1364 = vst.msk [vmem:[#allocation3] sm:$0xff] %vm927_vm3, %v1353_v39 }
 0x3d3   : > { %1333 = vst.msk [vmem:[#allocation3 + $0x8] sm:$0xff] %vm893_vm2, %v1323_v35 }
 0x3d5   : > { %v1385_v41 = vpop.permute.xlu0 %1384 }
 0x3d6   : > { %1396 = vst.msk [vmem:[#allocation3] sm:$0xff] %vm960_vm4, %v1385_v41 }
 0x3d9   : > { %v1417_v42 = vpop.permute.xlu0 %1416 }
 0x3da   : > { %1428 = vst.msk [vmem:[#allocation3] sm:$0xff] %vm993_vm5, %v1417_v42  ;;  %v1355_v43 = vpop.permute.xlu1 %1354 }
 0x3db   : > { %1365 = vst.msk [vmem:[#allocation3 + $0x8] sm:$0xff] %vm927_vm3, %v1355_v43 }
 0x3dd   : > { %v1419_v45 = vpop.permute.xlu0 %1418 }
 0x3de   : > { %v1387_v46 = vpop.permute.xlu1 %1386 }
 0x3df   : > { %1397 = vst.msk [vmem:[#allocation3 + $0x8] sm:$0xff] %vm960_vm4, %v1387_v46 }
 0x3e0   : > { %1429 = vst.msk [vmem:[#allocation3 + $0x8] sm:$0xff] %vm993_vm5, %v1419_v45 }
 0x3e1   : > { %v1229_v47 = vpop.permute.xlu0 %1228  ;;  %v1432_v48 = vld [vmem:[#allocation3] sm:$0xff] }
 0x3e2   : > { %v1197_v50 = vpop.permute.xlu1 %1196  ;;  %1910 = vmatprep.mubr.msk.bf16.mxu0 %vm1045_vm6, %v1432_v48 }
 0x3e3   : > { %1206 = vst.msk [vmem:[#allocation3 + $0x10] sm:$0xff] %vm761_vm12, %v1197_v50 }
 0x3e4   : > { %1238 = vst.msk [vmem:[#allocation3 + $0x10] sm:$0xff] %vm794_vm13, %v1229_v47 }
 0x3e5   : > { %v1261_v52 = vpop.permute.xlu0 %1260 }
 0x3e6   : > { %1270 = vst.msk [vmem:[#allocation3 + $0x10] sm:$0xff] %vm827_vm14, %v1261_v52  ;;  %v1263_v53 = vpop.permute.xlu1 %1262 }
 0x3e7   : > { %v1433_v55 = vld [vmem:[#allocation3 + $0x8] sm:$0xff] }
 0x3e8   : > { %1911 = vmatmul.mubr.msk.bf16.vlgmr.msra.gmra.mrb[8].mxu0 %vm1045_vm6, %v1433_v55 }
 0x3e9   : > { %v1293_v56 = vpop.permute.xlu0 %1292 }
 0x3ea   : > { %1302 = vst.msk [vmem:[#allocation3 + $0x10] sm:$0xff] %vm860_vm15, %v1293_v56  ;;  %v1295_v61 = vpop.permute.xlu1 %1294 }
 0x3ed   : > { %v1325_v63 = vpop.permute.xlu0 %1324 }
 0x3ee   : > { %1334 = vst.msk [vmem:[#allocation3 + $0x10] sm:$0xff] %vm893_vm2, %v1325_v63  ;;  %v1327_v49 = vpop.permute.xlu1 %1326 }
 0x3f1   : > { %v1357_v0 = vpop.permute.xlu0 %1356 }
 0x3f2   : > { %1366 = vst.msk [vmem:[#allocation3 + $0x10] sm:$0xff] %vm927_vm3, %v1357_v0  ;;  %v1359_v1 = vpop.permute.xlu1 %1358 }
 0x3f5   : > { %v1389_v51 = vpop.permute.xlu0 %1388 }
 0x3f6   : > { %1398 = vst.msk [vmem:[#allocation3 + $0x10] sm:$0xff] %vm960_vm4, %v1389_v51  ;;  %v1199_v2 = vpop.permute.xlu1 %1198 }
 0x3f7   : > { %1207 = vst.msk [vmem:[#allocation3 + $0x18] sm:$0xff] %vm761_vm12, %v1199_v2 }
 0x3f9   : > { %v1421_v5 = vpop.permute.xlu0 %1420 }
 0x3fa   : > { %1430 = vst.msk [vmem:[#allocation3 + $0x10] sm:$0xff] %vm993_vm5, %v1421_v5  ;;  %v1231_v8 = vpop.permute.xlu1 %1230 }
 0x3fb   : > { %1239 = vst.msk [vmem:[#allocation3 + $0x18] sm:$0xff] %vm794_vm13, %v1231_v8 }
 0x3fc   : > { %1271 = vst.msk [vmem:[#allocation3 + $0x18] sm:$0xff] %vm827_vm14, %v1263_v53 }
 0x3fd   : > { %1303 = vst.msk [vmem:[#allocation3 + $0x18] sm:$0xff] %vm860_vm15, %v1295_v61 }
 0x3fe   : > { %1335 = vst.msk [vmem:[#allocation3 + $0x18] sm:$0xff] %vm893_vm2, %v1327_v49  ;;  %v1391_v9 = vpop.permute.xlu1 %1390 }
 0x3ff   : > { %1367 = vst.msk [vmem:[#allocation3 + $0x18] sm:$0xff] %vm927_vm3, %v1359_v1 }
 0x400   : > { %1399 = vst.msk [vmem:[#allocation3 + $0x18] sm:$0xff] %vm960_vm4, %v1391_v9 }
 0x401   : > { %v1434_v10 = vld [vmem:[#allocation3 + $0x10] sm:$0xff] }
 0x402   : > { %v1423_v11 = vpop.permute.xlu1 %1422  ;;  %1914 = vmatprep.mubr.msk.bf16.mxu0 %vm1045_vm6, %v1434_v10 }
 0x403   : > { %1431 = vst.msk [vmem:[#allocation3 + $0x18] sm:$0xff] %vm993_vm5, %v1423_v11 }
 0x40a   : > { %v1435_v12 = vld [vmem:[#allocation3 + $0x18] sm:$0xff] }
 0x40b   : > { %1915 = vmatmul.mubr.msk.bf16.gmra.mrb[12].mxu0 %vm1045_vm6, %v1435_v12 }
 0x4bb   : > { %v1912_v14 = vpop.f32.mrb[8].mxu0 }
 0x4bc   : > { %v1537_v15 = vadd.f32 %v1912_v14, %v1816_v13  ;;  %v1528_v16 = vpop.f32.mrb[9].mxu0 }
 0x4bd   : > { %v1529_v18 = vadd.f32 %v1816_v13, %v1528_v16  ;;  %v1913_v19 = vpop.f32.mrb[10].mxu0 }
 0x4be   : > { %v1561_v20 = vadd.f32 %v1537_v15, %v2786_v33  ;;  %v1540_v21 = vadd.f32 %v1913_v19, %v1816_v13  ;;  %v1531_v22 = vpop.f32.mrb[11].mxu0 }
 0x4bf   : > { %v1559_v23 = vadd.f32 %v1529_v18, %v2790_v36  ;;  %v1532_v58 = vadd.f32 %v1816_v13, %v1531_v22 }
 0x4c0   : > { %vm1570_vm0 = vcmp.ge.f32.partialorder %v1561_v20, 0.0  ;;  %v1579_v24 = vmul.f32 %v1576_v17, %v1561_v20  ;;  %v1562_v25 = vadd.f32 %v1540_v21, %v2794_v40 }
 0x4c1   : > { %vm1568_vm1 = vcmp.ge.f32.partialorder %v1559_v23, 0.0  ;;  %v1577_v59 = vmul.f32 %v1576_v17, %v1559_v23  ;;  %v1560_v26 = vadd.f32 %v1532_v58, %v2798_v44 }
 0x4c2   : > { %v1587_v27 = vsel %vm1570_vm0, %v1561_v20, %v1579_v24  ;;  %vm1571_vm12 = vcmp.ge.f32.partialorder %v1562_v25, 0.0  ;;  %v1580_v28 = vmul.f32 %v1576_v17, %v1562_v25 }
 0x4c3   : > { %1595 = vst [vmem:[%s3048_s23 + $0x10] sm:$0xff] %v1587_v27  ;;  %v1585_v33 = vsel %vm1568_vm1, %v1559_v23, %v1577_v59  ;;  %vm1569_vm13 = vcmp.ge.f32.partialorder %v1560_v26, 0.0  ;;  %v1578_v36 = vmul.f32 %v1576_v17, %v1560_v26 }
 0x4c4   : > { %1593 = vst [vmem:[%s3048_s23] sm:$0xff] %v1585_v33  ;;  %v1588_v40 = vsel %vm1571_vm12, %v1562_v25, %v1580_v28 }
 0x4c5   : > { %1596 = vst [vmem:[%s3048_s23 + $0x18] sm:$0xff] %v1588_v40  ;;  %v1586_v29 = vsel %vm1569_vm13, %v1560_v26, %v1578_v36 }
 0x4c6   : > { %1594 = vst [vmem:[%s3048_s23 + $0x8] sm:$0xff] %v1586_v29 }
 0x4de   : > { %v1916_v44 = vpop.f32.mrb[12].mxu0 }
 0x4df   : > { %v1553_v54 = vadd.f32 %v1916_v44, %v1816_v13  ;;  %v1544_v30 = vpop.f32.mrb[13].mxu0 }
 0x4e0   : > { %v1545_v57 = vadd.f32 %v1816_v13, %v1544_v30  ;;  %v1917_v31 = vpop.f32.mrb[14].mxu0 }
 0x4e1   : > { %v1565_v32 = vadd.f32 %v1553_v54, %v2808_v60  ;;  %v1556_v34 = vadd.f32 %v1917_v31, %v1816_v13  ;;  %v1547_v35 = vpop.f32.mrb[15].mxu0 }
 0x4e2   : > { %v1563_v37 = vadd.f32 %v1545_v57, %v2812_v62  ;;  %v1548_v4 = vadd.f32 %v1816_v13, %v1547_v35 }
 0x4e3   : > { %vm1574_vm14 = vcmp.ge.f32.partialorder %v1565_v32, 0.0  ;;  %v1583_v6 = vmul.f32 %v1576_v17, %v1565_v32  ;;  %v1566_v38 = vadd.f32 %v1556_v34, %v2816_v3 }
 0x4e4   : > { %vm1572_vm15 = vcmp.ge.f32.partialorder %v1563_v37, 0.0  ;;  %v1581_v39 = vmul.f32 %v1576_v17, %v1563_v37  ;;  %v1564_v41 = vadd.f32 %v1548_v4, %v2823_v7 }
 0x4e5   : > { %v1591_v60 = vsel %vm1574_vm14, %v1565_v32, %v1583_v6  ;;  %vm1575_vm2 = vcmp.ge.f32.partialorder %v1566_v38, 0.0  ;;  %v1584_v42 = vmul.f32 %v1576_v17, %v1566_v38 }
 0x4e6   : > { %1599 = vst [vmem:[%s3048_s23 + $0x30] sm:$0xff] %v1591_v60  ;;  %v1589_v62 = vsel %vm1572_vm15, %v1563_v37, %v1581_v39  ;;  %vm1573_vm3 = vcmp.ge.f32.partialorder %v1564_v41, 0.0  ;;  %v1582_v43 = vmul.f32 %v1576_v17, %v1564_v41 }
 0x4e7   : > { %1597 = vst [vmem:[%s3048_s23 + $0x20] sm:$0xff] %v1589_v62  ;;  %v1592_v3 = vsel %vm1575_vm2, %v1566_v38, %v1584_v42 }
 0x4e8   : > { %1600 = vst [vmem:[%s3048_s23 + $0x38] sm:$0xff] %v1592_v3  ;;  %v1590_v7 = vsel %vm1573_vm3, %v1564_v41, %v1582_v43 }
 0x4e9   : > { %1598 = vst [vmem:[%s3048_s23 + $0x28] sm:$0xff] %v1590_v7 }
 0x4ea   : > { %2301 = shalt.err (!%p2298_p13)
}
 0x4eb   : > { %s2302_s1 = scalar_lea.hbm %s3064_s11, 1024  ;;  %s2306_s19 = scalar_lea.hbm %s3122_s8, 2048 }
 0x4ec   : > { %p2303_p0 = scmp.ne.s32.totalorder %s3064_s11, %s2302_s1  ;;  %p2307_p1 = scmp.lt.u32.totalorder %s3064_s11, %s3122_s8 }
 0x4ed   : > { %p2308_p12 = scmp.lt.u32.totalorder %s2306_s19, %s2302_s1  ;;  %p2310_p2 = scmp.lt.u32.totalorder %s2302_s1, %s3064_s11 }
 0x4ee   : > { %p2304_p7 = pnand %p2303_p0, %p3150_p5 }
 0x4ef   : > { %p2309_p3 = por %p2308_p12, %p2307_p1 }
 0x4f0   : > { %p2305_p11 = pneg %p2304_p7 }
 0x4f1   : > { %p2311_p9 = por %p2310_p2, %p2309_p3 }
 0x4f3   : > { %p2312_p4 = pnand %p2311_p9, %p2305_p11 }
 0x4f5   : > { %2315 = shalt.err (!%p2312_p4)
}
 0x4f6   : > { %s2392_s21 = smov 128  }
 0x4f7   : > { %1960 = dma.vmem_to_hbm [thread:$0]  (%p3150_p5), %s3067_s12, 1024, %s3064_s11, %s1602_s9, %s2392_s21, %s2392_s21, %s2384_s18  }
 0x4f8 PF: > { %s1630_s17 = sand.u32 1, %s2358_s27   ;;  %p3151_p10 = scmp.ne.s32.totalorder %s3138_s16, 0 }
 0x4f9   : > { %p3152_p8 = scmp.ge.s32.totalorder %s2370_s30, 2  ;;  %s1631_s20 = scalar_lea.sflag [#allocation6], %s1630_s17 }
 0x4fb   : > { %p1989_p6 = pnand %p3152_p8, %p3151_p10 }
 0x4fd   : > { %2353 = dma.done.wait (!%p1989_p6), %s1631_s20, 1024  }
 0x4fe   : > { %2355 = vsyncadd (!%p1989_p6), %s1631_s20, 4294966272  ;;  %p25_p13 = scmp.ge.s32.totalorder %s2640_s15, 4   ;;  %s3153_s27 = smov %s2362_s28 }
 0x4ff   : > { %s3154_s28 = smov %s2366_s29  ;;  %s3155_s29 = smov %s2652_s25 }
 0x500   : > { %s3156_s30 = smov %s2640_s15  ;;  %27 = sbr.rel (!%p25_p13) target bundleno = 11 (0xb), region = 131 }
 0x507   :  { %1636 = vsyncpa [#allocation5], 1 }
 0x508   :  { %1638 = vsyncpa [#allocation5 + $0x1], 1 }
 0x509   :  { %1639 = vsyncpa [#allocation9], 1 }
 0x50a   :  { %1640 = vsyncpa [#allocation12], 1 }
 0x50b   :  { %1641 = vsyncpa [#allocation15], 1 }
 0x50c   :  { %1642 = vsyncpa [#allocation6], 1 }
 0x50d   :  { %1644 = vsyncpa [#allocation6 + $0x1], 1 }
 0x50e   :  { %1645 = vsyncpa [#allocation7], 1 }
 0x50f   :  { %1647 = vsyncpa [#allocation7 + $0x1], 1 }

</bundles_post_ra>
